<compile_context>
chip_gen: v5e
topology: v5e:2x2
jax: 0.10.0
libtpu: 0.0.40
codegen_flags: <defaults>
</compile_context>

<pallas_src>
import jax
import jax.numpy as jnp
from jax.experimental import pallas as pl
from jax.experimental.pallas import tpu as pltpu

DIM = 128
IN_FEATURES = 128
OUT_FEATURES = 4 * 4 * 4 * DIM  # 8192
BN_EPS = 1e-5


def _gen_kernel(x_ref, w_ref, gamma_ref, beta_ref, o_ref):
    # One grid step handles a (B, tn) slab of output features:
    #   matmul -> batch-norm over the batch axis -> affine -> ReLU.
    # The Linear bias is intentionally omitted: BN's mean subtraction cancels
    # any per-feature additive constant exactly.
    x = x_ref[...]                                    # (B, K) f32
    w = w_ref[...].astype(jnp.float32)                # (K, tn) (f32 or bf16 stream)
    y = jnp.dot(x, w, preferred_element_type=jnp.float32)  # (B, tn)

    # BatchNorm1d (training mode): per-feature mean / biased variance over the
    # batch dim, eps = 1e-5 — matches PyTorch's forward normalization.
    mean = jnp.mean(y, axis=0, keepdims=True)         # (1, tn)
    diff = y - mean
    var = jnp.mean(diff * diff, axis=0, keepdims=True)
    y_hat = diff * jax.lax.rsqrt(var + BN_EPS)
    out = y_hat * gamma_ref[...] + beta_ref[...]

    # ReLU
    o_ref[...] = jnp.maximum(out, 0.0)


def generator_forward(x, w, b, gamma, beta, *, tn=2048, w_bf16=False):
    """x: (B, 128) f32 -> (B, 4*DIM, 4, 4) f32.

    `b` (the Linear bias) is accepted for API parity with nn.Linear but is not
    streamed into the kernel: BatchNorm's mean subtraction cancels it exactly.
    """
    del b  # algebraically dead under training-mode BatchNorm
    B, K = x.shape
    assert K == IN_FEATURES
    F = w.shape[1]
    assert F == OUT_FEATURES and F % tn == 0
    # Keep grid >= 4 so v7x's two TensorCores each get pipelined work.
    assert F // tn >= 4, "keep at least 4 feature tiles for megacore + pipelining"

    if w_bf16:
        # Optional: halve weight HBM traffic. Numerics differ slightly from
        # the f32 PyTorch reference (bf16 mantissa), so off by default.
        w = w.astype(jnp.bfloat16)

    cost = pl.CostEstimate(
        flops=2 * B * K * F,
        transcendentals=F,  # one rsqrt per feature
        bytes_accessed=w.dtype.itemsize * K * F + 4 * (B * F + B * K + 2 * F),
    )

    out2d = pl.pallas_call(
        _gen_kernel,
        out_shape=jax.ShapeDtypeStruct((B, F), jnp.float32),
        grid_spec=pltpu.PrefetchScalarGridSpec(
            num_scalar_prefetch=0,
            grid=(F // tn,),
            in_specs=[
                pl.BlockSpec((B, K), lambda j: (0, 0)),    # x (full, resident each step)
                pl.BlockSpec((K, tn), lambda j: (0, j)),   # W tile (1 MiB @ f32, tn=2048)
                pl.BlockSpec((1, tn), lambda j: (0, j)),   # gamma tile
                pl.BlockSpec((1, tn), lambda j: (0, j)),   # beta tile
            ],
            out_specs=pl.BlockSpec((B, tn), lambda j: (0, j)),
        ),
        compiler_params=pltpu.CompilerParams(
            dimension_semantics=("parallel",),
        ),
        cost_estimate=cost,
    )(x, w, gamma, beta)

    # Matches PyTorch: output.view(-1, 4 * DIM, 4, 4)
    return out2d.reshape(B, 4 * DIM, 4, 4)


def make_params(key):
    kw, kb = jax.random.split(key)
    # Deterministic synthetic init (shapes match nn.Linear(128, 8192) + BatchNorm1d(8192)).
    bound = 1.0 / jnp.sqrt(IN_FEATURES)
    w = jax.random.uniform(kw, (IN_FEATURES, OUT_FEATURES), jnp.float32, -bound, bound)
    b = jax.random.uniform(kb, (1, OUT_FEATURES), jnp.float32, -bound, bound)
    gamma = jnp.ones((1, OUT_FEATURES), jnp.float32)   # BatchNorm1d default weight
    beta = jnp.zeros((1, OUT_FEATURES), jnp.float32)   # BatchNorm1d default bias
    return w, b, gamma, beta


def _reference_forward(x, w, b, gamma, beta):
    # Pure-JAX reference of the PyTorch module (training-mode BN, biased var).
    y = x @ w + b
    mean = jnp.mean(y, axis=0, keepdims=True)
    var = jnp.mean((y - mean) ** 2, axis=0, keepdims=True)
    y_hat = (y - mean) / jnp.sqrt(var + BN_EPS)
    out = jnp.maximum(y_hat * gamma + beta, 0.0)
    return out.reshape(x.shape[0], 4 * DIM, 4, 4)


if __name__ == "__main__":
    key = jax.random.PRNGKey(0)
    k_x, k_p = jax.random.split(key)

    B = 8  # batch (>= 2 needed for training-mode BatchNorm1d; 8 = one f32 sublane)
    x = jax.random.normal(k_x, (B, IN_FEATURES), jnp.float32)
    w, b, gamma, beta = make_params(k_p)

    out = generator_forward(x, w, b, gamma, beta)
    out = jax.block_until_ready(out)

    assert out.shape == (B, 4 * DIM, 4, 4), out.shape
    assert out.dtype == jnp.float32

    ref = _reference_forward(x, w, b, gamma, beta)
    assert jnp.allclose(out, ref, atol=1e-3, rtol=1e-3), float(jnp.max(jnp.abs(out - ref)))

    print("KERNEL_OK")
</pallas_src>

<mosaic_0001>
module attributes {stable_mosaic.version = 11 : i64} {
  func.func @_gen_kernel(%arg0: i32, %arg1: memref<8x128xf32, #tpu.memory_space<vmem>>, %arg2: memref<128x2048xf32, #tpu.memory_space<vmem>>, %arg3: memref<1x2048xf32, #tpu.memory_space<vmem>>, %arg4: memref<1x2048xf32, #tpu.memory_space<vmem>>, %arg5: memref<8x2048xf32, #tpu.memory_space<vmem>>) attributes {dimension_semantics = [#tpu.dimension_semantics<parallel>], iteration_bounds = array<i64: 4>, scalar_prefetch = 0 : i64, scratch_operands = 0 : i64, tpu.core_type = #tpu.core_type<tc>, window_params = [{pipeline_mode = #tpu.pipeline_mode<synchronous>, transform_indices = @transform_0, window_bounds = array<i64: 8, 128>}, {transform_indices = @transform_1, window_bounds = array<i64: 128, 2048>}, {transform_indices = @transform_2, window_bounds = array<i64: 1, 2048>}, {transform_indices = @transform_3, window_bounds = array<i64: 1, 2048>}, {transform_indices = @transform_4, window_bounds = array<i64: 8, 2048>}]} {
    %c0 = arith.constant 0 : index
    %c0_0 = arith.constant 0 : index
    %0 = vector.load %arg1[%c0, %c0_0] : memref<8x128xf32, #tpu.memory_space<vmem>>, vector<8x128xf32>
    %c0_1 = arith.constant 0 : index
    %c0_2 = arith.constant 0 : index
    %1 = vector.load %arg2[%c0_1, %c0_2] : memref<128x2048xf32, #tpu.memory_space<vmem>>, vector<128x2048xf32>
    %cst = arith.constant dense<0.000000e+00> : vector<8x2048xf32>
    %2 = tpu.matmul %0, %1, %cst {dimension_numbers = #tpu.dot_dimension_numbers<[1], [0], [0], [1], [0, 0, 1, 1], [], []>} : vector<8x128xf32>, vector<128x2048xf32>, vector<8x2048xf32> -> vector<8x2048xf32>
    %cst_3 = arith.constant dense<0.000000e+00> : vector<2048xf32>
    %3 = vector.multi_reduction <add>, %2, %cst_3 [0] : vector<8x2048xf32> to vector<2048xf32>
    %4 = vector.shape_cast %3 : vector<2048xf32> to vector<1x2048xf32>
    %cst_4 = arith.constant 8.000000e+00 : f32
    %5 = vector.broadcast %cst_4 : f32 to vector<1x2048xf32>
    %6 = arith.divf %4, %5 : vector<1x2048xf32>
    %7 = vector.broadcast %6 : vector<1x2048xf32> to vector<8x2048xf32>
    %8 = arith.subf %2, %7 : vector<8x2048xf32>
    %9 = arith.mulf %8, %8 : vector<8x2048xf32>
    %cst_5 = arith.constant dense<0.000000e+00> : vector<2048xf32>
    %10 = vector.multi_reduction <add>, %9, %cst_5 [0] : vector<8x2048xf32> to vector<2048xf32>
    %11 = vector.shape_cast %10 : vector<2048xf32> to vector<1x2048xf32>
    %cst_6 = arith.constant 8.000000e+00 : f32
    %12 = vector.broadcast %cst_6 : f32 to vector<1x2048xf32>
    %13 = arith.divf %11, %12 : vector<1x2048xf32>
    %cst_7 = arith.constant 9.99999974E-6 : f32
    %14 = vector.broadcast %cst_7 : f32 to vector<1x2048xf32>
    %15 = arith.addf %13, %14 : vector<1x2048xf32>
    %16 = math.rsqrt %15 : vector<1x2048xf32>
    %17 = vector.broadcast %16 : vector<1x2048xf32> to vector<8x2048xf32>
    %18 = arith.mulf %8, %17 : vector<8x2048xf32>
    %c0_8 = arith.constant 0 : index
    %c0_9 = arith.constant 0 : index
    %19 = vector.load %arg3[%c0_8, %c0_9] : memref<1x2048xf32, #tpu.memory_space<vmem>>, vector<1x2048xf32>
    %20 = vector.broadcast %19 : vector<1x2048xf32> to vector<8x2048xf32>
    %21 = arith.mulf %18, %20 : vector<8x2048xf32>
    %c0_10 = arith.constant 0 : index
    %c0_11 = arith.constant 0 : index
    %22 = vector.load %arg4[%c0_10, %c0_11] : memref<1x2048xf32, #tpu.memory_space<vmem>>, vector<1x2048xf32>
    %23 = vector.broadcast %22 : vector<1x2048xf32> to vector<8x2048xf32>
    %24 = arith.addf %21, %23 : vector<8x2048xf32>
    %cst_12 = arith.constant 0.000000e+00 : f32
    %25 = vector.broadcast %cst_12 : f32 to vector<8x2048xf32>
    %26 = arith.maximumf %24, %25 : vector<8x2048xf32>
    %c0_13 = arith.constant 0 : index
    %c0_14 = arith.constant 0 : index
    %27 = vector.load %arg5[%c0_13, %c0_14] : memref<8x2048xf32, #tpu.memory_space<vmem>>, vector<8x2048xf32>
    tpu.vector_store %arg5[%c0_13, %c0_14], %26 {strides = array<i32>} : memref<8x2048xf32, #tpu.memory_space<vmem>>, vector<8x2048xf32>,
    return
  }
  func.func @transform_0(%arg0: i32) -> (i32, i32) {
    %c0_i32 = arith.constant 0 : i32
    %c0_i32_0 = arith.constant 0 : i32
    %c0_i32_1 = arith.constant 0 : i32
    return %c0_i32, %c0_i32_0 : i32, i32
  }
  func.func @transform_1(%arg0: i32) -> (i32, i32) {
    %c0_i32 = arith.constant 0 : i32
    %c0_i32_0 = arith.constant 0 : i32
    return %c0_i32, %arg0 : i32, i32
  }
  func.func @transform_2(%arg0: i32) -> (i32, i32) {
    %c0_i32 = arith.constant 0 : i32
    %c0_i32_0 = arith.constant 0 : i32
    return %c0_i32, %arg0 : i32, i32
  }
  func.func @transform_3(%arg0: i32) -> (i32, i32) {
    %c0_i32 = arith.constant 0 : i32
    %c0_i32_0 = arith.constant 0 : i32
    return %c0_i32, %arg0 : i32, i32
  }
  func.func @transform_4(%arg0: i32) -> (i32, i32) {
    %c0_i32 = arith.constant 0 : i32
    %c0_i32_0 = arith.constant 0 : i32
    return %c0_i32, %arg0 : i32, i32
  }
}

</mosaic_0001>

<bundles_post_ra>
// kernel: tpu_custom_call.1
= control target key start
LH: loop header
LB: loop body
LE: loop exit
PB: predicated region body
PF: predicated region fallthrough
CT: control target
= control target key end

     0   :  { %s2787_s0 = inlined_call_operand.hbm [shape: f32[8,128], index: 0, kind: input, shape index: {}]   ;;  %s2788_s1 = inlined_call_operand.hbm [shape: f32[128,8192], index: 1, kind: input, shape index: {}]   ;;  %s2789_s2 = inlined_call_operand.hbm [shape: f32[1,8192], index: 2, kind: input, shape index: {}]   ;;  %s2790_s3 = inlined_call_operand.hbm [shape: f32[1,8192], index: 3, kind: input, shape index: {}]   ;;  %s2791_s4 = inlined_call_operand.hbm [shape: f32[8,8192], index: 4, kind: output, shape index: {}]  }
   0x1   :  { %2792 = sst [smem:[#allocation16_spill]] %s2787_s0 }
   0x2   :  { %2793 = sst [smem:[#allocation17_spill]] %s2788_s1 }
   0x3   :  { %9 = vsyncpa [#allocation3], 0 }
   0x4   :  { %10 = vsyncpa [#allocation6], 0 }
   0x5   :  { %12 = vsyncpa [#allocation6 + $0x1], 0 }
   0x6   :  { %13 = vsyncpa [#allocation9], 0 }
   0x7   :  { %15 = vsyncpa [#allocation9 + $0x1], 0 }
   0x8   :  { %16 = vsyncpa [#allocation4], 0 }
   0x9   :  { %18 = vsyncpa [#allocation4 + $0x1], 0  ;;  %s1977_s15 = smov 0   ;;  %s1979_s16 = smov 0  }
   0xa   :  { %s1981_s17 = smov 0   ;;  %s1983_s18 = smov 0  }
   0xb LB: > { %s1998_s19 = sadd.s32 1, %s1945_s18   ;;  %s52_s20 = sadd.s32 1, %s1941_s17  ;;  %s1945_s18 = sphi %s1983_s18, %s2814_s18   ;;  %s1941_s17 = sphi %s1981_s17, %s2813_s17   ;;  %s1937_s16 = sphi %s1979_s16, %s2812_s16   ;;  %s1933_s15 = sphi %s1977_s15, %s2811_s15  }
   0xc   : > { %s49_s21 = ssub.s32 %s1945_s18, %s1998_s19  ;;  %p59_p0 = scmp.ne.s32.totalorder %s1941_s17, %s1937_s16 }
   0xd   : > { %p50_p1 = scmp.eq.s32.totalorder %s49_s21, 0  ;;  %p60_p2 = scmp.eq.s32.totalorder %s1945_s18, 0 }
   0xe   : > { %p1677_p3 = scmp.lt.s32.totalorder %s1945_s18, 4  ;;  %s179_s23 = sand.u32 1, %s1945_s18  }
   0xf   : > { %s2008_s22 = scalar_select %p50_p1, %s1941_s17, %s52_s20  }
  0x10   : > { %p61_p4 = por %p60_p2, %p59_p0  ;;  %s2015_s24 = sand.u32 1, %s1941_s17  }
  0x11   : > { %2794 = sst [smem:[#allocation15_spill]] %s2008_s22  ;;  %s1626_s25 = sshll.u32 %s2015_s24, 11 }
  0x12   : > { %s1644_s26 = sshll.u32 %s1945_s18, 7  ;;  %s2795_s1 = sld [smem:[#allocation17_spill]] }
  0x13   : > { %s183_s5 = scalar_lea.vmem [#allocation5], %s1626_s25  ;;  %p2024_p5 = pnand %p1677_p3, %p61_p4 }
  0x14   : > { %s191_s6 = sshll.u32 %s183_s5, 4  ;;  %s2028_s8 = scalar_lea.sflag [#allocation6], %s179_s23  ;;  %s192_s6 = int_to_ptr.vmem [resolvable:$true] %s191_s6 }
  0x15   : > { %p1755_p7 = pneg %p2024_p5 }
  0x18   : > { %s188_s29 = scalar_lea.hbm %s2795_s1, %s1644_s26  ;;  %s1758_s13 = scalar_lea.hbm %s2795_s1, 8192 }
  0x19   : > { %s189_s30 = sshll.u32 %s188_s29, 4  ;;  %s190_s30 = int_to_ptr.hbm [resolvable:$true] %s189_s30 }
  0x1a   : > { %s1751_s9 = sshra.s32 %s190_s30, 4  ;;  %s1752_s9 = int_to_ptr.hbm [resolvable:$true] %s1751_s9 }
  0x1b   : > { %s1753_s10 = scalar_lea.hbm %s1752_s9, 2048  ;;  %p1759_p10 = scmp.lt.s32.totalorder %s1752_s9, %s2795_s1 }
  0x1c   : > { %p1754_p6 = scmp.ne.s32.totalorder %s1752_s9, %s1753_s10  ;;  %p1760_p11 = scmp.lt.s32.totalorder %s1758_s13, %s1753_s10 }
  0x1e   : > { %p1756_p8 = pnand %p1755_p7, %p1754_p6  ;;  %p1761_p12 = por %p1760_p11, %p1759_p10 }
  0x20   : > { %p1757_p9 = pneg %p1756_p8 }
  0x22   : > { %p1762_p13 = pnand %p1761_p12, %p1757_p9 }
  0x24   : > { %1765 = shalt.err (!%p1762_p13)
}
  0x25   : > { %s1947_s21 = smov 8192   ;;  %s1948_s23 = smov 2048  }
  0x26   : > { %s1949_s25 = smov 128   ;;  %s2045_s26 = sadd.s32 4294967295, %s1945_s18  }
  0x27   : > { %1665 = dma.hbm_to_vmem [thread:$0]  (!%p2024_p5), %s190_s30, 32768, %s192_s6, %s2028_s8, %s1947_s21, %s1948_s23, %s1949_s25  }
  0x28   : > { %s1622_s27 = sadd.s32 4294967294, %s1945_s18   ;;  %p65_p1 = scmp.ne.s32.totalorder %s1937_s16, %s1933_s15 }
  0x29   : > { %p66_p2 = scmp.eq.s32.totalorder %s2045_s26, 0  ;;  %p141_p3 = scmp.eq.s32.totalorder %s2045_s26, 3 }
  0x2a   : > { %p147_p4 = scmp.eq.s32.totalorder %s1622_s27, 3  ;;  %p1623_p6 = scmp.ge.s32.totalorder %s1945_s18, 1 }
  0x2b   : > { %p2055_p8 = por %p66_p2, %p65_p1  ;;  %p2062_p9 = por %p141_p3, %p59_p0 }
  0x2c   : > { %p2066_p10 = por %p147_p4, %p65_p1  ;;  %p154_p11 = scmp.lt.s32.totalorder %s1945_s18, 5 }
  0x2d   : > { %s2800_s0 = sld [smem:[#allocation16_spill]]  ;;  %s1629_s11 = sshll.u32 %s2015_s24, 4 }
  0x2e   : > { %p2074_p12 = pnand %p1623_p6, %p154_p11  ;;  %s1950_s12 = smov [#allocation2]  }
  0x2f   : > { %s168_s13 = sshll.u32 %s1950_s12, 4  ;;  %s1630_s14 = sshll.u32 %s1945_s18, 4  ;;  %s169_s13 = int_to_ptr.vmem [resolvable:$true] %s168_s13 }
  0x30   : > { %p1658_p0 = pneg %p2074_p12  ;;  %s209_s23 = scalar_lea.hbm %s2789_s2, %s1630_s14 }
  0x31   : > { %s205_s25 = scalar_lea.vmem [#allocation7], %s1629_s11  ;;  %s211_s5 = sshll.u32 %s209_s23, 4  ;;  %s212_s5 = int_to_ptr.hbm [resolvable:$true] %s211_s5 }
  0x32   : > { %p1659_p13 = pnand %p1658_p0, %p66_p2  ;;  %s213_s27 = sshll.u32 %s205_s25, 4  ;;  %s214_s27 = int_to_ptr.vmem [resolvable:$true] %s213_s27 }
  0x33   : > { %s166_s9 = sshll.u32 %s2800_s0, 4  ;;  %s1811_s6 = sshra.s32 %s212_s5, 4  ;;  %s167_s9 = int_to_ptr.hbm [resolvable:$true] %s166_s9  ;;  %s1812_s6 = int_to_ptr.hbm [resolvable:$true] %s1811_s6 }
  0x34   : > { %1661 = dma.hbm_to_vmem [thread:$0]  (!%p1659_p13), %s167_s9, 128, %s169_s13, [#allocation3]  }
  0x35   : > { %s1813_s0 = scalar_lea.hbm %s1812_s6, 16  ;;  %s1818_s22 = scalar_lea.hbm %s2789_s2, 64 }
  0x36   : > { %p1814_p1 = scmp.ne.s32.totalorder %s1812_s6, %s1813_s0  ;;  %p1819_p6 = scmp.lt.s32.totalorder %s1812_s6, %s2789_s2 }
  0x37   : > { %p1820_p11 = scmp.lt.s32.totalorder %s1818_s22, %s1813_s0 }
  0x38   : > { %p1816_p3 = pnand %p1814_p1, %p1755_p7 }
  0x39   : > { %p1821_p0 = por %p1820_p11, %p1819_p6 }
  0x3a   : > { %p1817_p4 = pneg %p1816_p3 }
  0x3c   : > { %p1822_p13 = pnand %p1821_p0, %p1817_p4 }
  0x3e   : > { %1825 = shalt.err (!%p1822_p13)
}
  0x3f   : > { %1668 = dma.hbm_to_vmem [thread:$0]  (!%p2024_p5), %s212_s5, 256, %s214_s27, %s2028_s8  }
  0x40   : > { %s228_s23 = scalar_lea.hbm %s2790_s3, %s1630_s14  ;;  %s224_s1 = scalar_lea.vmem [#allocation8], %s1629_s11 }
  0x41   : > { %s232_s25 = sshll.u32 %s224_s1, 4  ;;  %s230_s12 = sshll.u32 %s228_s23, 4  ;;  %s233_s25 = int_to_ptr.vmem [resolvable:$true] %s232_s25  ;;  %s231_s12 = int_to_ptr.hbm [resolvable:$true] %s230_s12 }
  0x42   : > { %s221_s6 = scalar_lea.sflag [#allocation9], %s2015_s24  ;;  %s1841_s0 = sshra.s32 %s231_s12, 4  ;;  %s1842_s0 = int_to_ptr.hbm [resolvable:$true] %s1841_s0 }
  0x43   : > { %s1843_s22 = scalar_lea.hbm %s1842_s0, 16  ;;  %s1848_s27 = scalar_lea.hbm %s2790_s3, 64 }
  0x44   : > { %p1844_p1 = scmp.ne.s32.totalorder %s1842_s0, %s1843_s22  ;;  %p1849_p6 = scmp.lt.s32.totalorder %s1842_s0, %s2790_s3 }
  0x45   : > { %p1850_p11 = scmp.lt.s32.totalorder %s1848_s27, %s1843_s22 }
  0x46   : > { %p1846_p3 = pnand %p1844_p1, %p1755_p7 }
  0x47   : > { %p1851_p0 = por %p1850_p11, %p1849_p6 }
  0x48   : > { %p1847_p4 = pneg %p1846_p3 }
  0x4a   : > { %p1852_p13 = pnand %p1851_p0, %p1847_p4 }
  0x4c   : > { %1855 = shalt.err (!%p1852_p13)
}
  0x4d   : > { %1671 = dma.hbm_to_vmem [thread:$0]  (!%p2024_p5), %s231_s12, 256, %s233_s25, %s221_s6  }
  0x4e   : > { %241 = sbr.rel (%p2074_p12) target bundleno = 426 (0x1aa), region = 36 }
  0x53   : > { %1916 = dma.done.wait (%p66_p2), [#allocation3], 128  }
  0x54   : > { %1918 = vsyncadd (%p66_p2), [#allocation3], 4294967168  ;;  %s248_s24 = sand.u32 1, %s2045_s26   ;;  %s2122_s11 = sand.u32 1, %s1937_s16  }
  0x55   : > { %s1635_s21 = sshll.u32 %s2122_s11, 11  ;;  %s249_s9 = scalar_lea.sflag [#allocation6], %s248_s24 }
  0x56   : > { %s2125_s7 = scalar_lea.vmem [#allocation5], %s1635_s21 }
  0x57   : > { %1920 = dma.done.wait (%p2055_p8), %s249_s9, 33024  }
  0x58   : > { %1922 = vsyncadd (%p2055_p8), %s249_s9, 4294934272  ;;  %s1636_s10 = sshll.u32 %s2122_s11, 4  ;;  %s269_s23 = scalar_lea.sflag [#allocation9], %s2122_s11 }
  0x59   : > { %s2132_s13 = scalar_lea.vmem [#allocation7], %s1636_s10  ;;  %s2135_s1 = scalar_lea.vmem [#allocation8], %s1636_s10 }
  0x5a   : > { %1924 = dma.done.wait (%p2055_p8), %s269_s23, 256  }
  0x5b   : > { %1926 = vsyncadd (%p2055_p8), %s269_s23, 4294967040  ;;  %v553_v0 = vld [vmem:[%s2125_s7 + $0x780] sm:$0xff]  ;;  %v554_v1 = vld [vmem:[%s2125_s7 + $0x788] sm:$0xff]  ;;  %s1638_s28 = sshll.u32 %s2122_s11, 7  ;;  %s1645_s12 = sshll.u32 %s2045_s26, 7 }
  0x5c   : > { %v555_v2 = vld [vmem:[%s2125_s7 + $0x790] sm:$0xff]  ;;  %569 = vmatpush.msra.mxu0 %v553_v0  ;;  %589 = vmatpush.msra.mxu1 %v554_v1  ;;  %v556_v3 = vld [vmem:[%s2125_s7 + $0x798] sm:$0xff]  ;;  %v537_v4 = vld [vmem:[%s2125_s7 + $0x700] sm:$0xff]  ;;  %s2534_s25 = scalar_lea.vmem [#allocation10], %s1638_s28  ;;  %s1492_s26 = scalar_lea.hbm %s2791_s4, %s1645_s12 }
  0x5d   : > { %v538_v5 = vld [vmem:[%s2125_s7 + $0x708] sm:$0xff]  ;;  %609 = vmatpush.msra.mxu2 %v555_v2  ;;  %629 = vmatpush.msra.mxu3 %v556_v3  ;;  %v539_v6 = vld [vmem:[%s2125_s7 + $0x710] sm:$0xff]  ;;  %v540_v7 = vld [vmem:[%s2125_s7 + $0x718] sm:$0xff]  ;;  %s1494_s22 = sshll.u32 %s2534_s25, 4  ;;  %s1496_s20 = sshll.u32 %s1492_s26, 4  ;;  %s1495_s22 = int_to_ptr.vmem [resolvable:$true] %s1494_s22  ;;  %s1497_s20 = int_to_ptr.hbm [resolvable:$true] %s1496_s20 }
  0x5e   : > { %v521_v8 = vld [vmem:[%s2125_s7 + $0x680] sm:$0xff]  ;;  %570 = vmatpush.msra.mxu0 %v537_v4  ;;  %590 = vmatpush.msra.mxu1 %v538_v5  ;;  %v522_v9 = vld [vmem:[%s2125_s7 + $0x688] sm:$0xff]  ;;  %v523_v10 = vld [vmem:[%s2125_s7 + $0x690] sm:$0xff]  ;;  %s1481_s8 = scalar_lea.sflag [#allocation4], %s2122_s11  ;;  %s1885_s27 = sshra.s32 %s1497_s20, 4  ;;  %s1886_s27 = int_to_ptr.hbm [resolvable:$true] %s1885_s27 }
  0x5f   : > { %v524_v11 = vld [vmem:[%s2125_s7 + $0x698] sm:$0xff]  ;;  %610 = vmatpush.msra.mxu2 %v539_v6  ;;  %630 = vmatpush.msra.mxu3 %v540_v7  ;;  %v505_v12 = vld [vmem:[%s2125_s7 + $0x600] sm:$0xff]  ;;  %v506_v13 = vld [vmem:[%s2125_s7 + $0x608] sm:$0xff]  ;;  %s1887_s5 = scalar_lea.hbm %s1886_s27, 128  ;;  %s1891_s21 = scalar_lea.hbm %s2791_s4, 512 }
  0x60   : > { %571 = vmatpush.msra.mxu0 %v521_v8  ;;  %591 = vmatpush.msra.mxu1 %v522_v9  ;;  %v507_v14 = vld [vmem:[%s2125_s7 + $0x610] sm:$0xff]  ;;  %v508_v15 = vld [vmem:[%s2125_s7 + $0x618] sm:$0xff]  ;;  %v489_v16 = vld [vmem:[%s2125_s7 + $0x580] sm:$0xff]  ;;  %p1888_p5 = scmp.ne.s32.totalorder %s1886_s27, %s1887_s5  ;;  %p1892_p8 = scmp.lt.s32.totalorder %s1886_s27, %s2791_s4 }
  0x61   : > { %611 = vmatpush.msra.mxu2 %v523_v10  ;;  %631 = vmatpush.msra.mxu3 %v524_v11  ;;  %v490_v17 = vld [vmem:[%s2125_s7 + $0x588] sm:$0xff]  ;;  %v491_v18 = vld [vmem:[%s2125_s7 + $0x590] sm:$0xff]  ;;  %v492_v19 = vld [vmem:[%s2125_s7 + $0x598] sm:$0xff]  ;;  %p1893_p12 = scmp.lt.s32.totalorder %s1891_s21, %s1887_s5 }
  0x62   : > { %572 = vmatpush.msra.mxu0 %v505_v12  ;;  %592 = vmatpush.msra.mxu1 %v506_v13  ;;  %v473_v20 = vld [vmem:[%s2125_s7 + $0x500] sm:$0xff]  ;;  %v474_v21 = vld [vmem:[%s2125_s7 + $0x508] sm:$0xff]  ;;  %v475_v22 = vld [vmem:[%s2125_s7 + $0x510] sm:$0xff]  ;;  %p1889_p7 = pnand %p1888_p5, %p2062_p9 }
  0x63   : > { %612 = vmatpush.msra.mxu2 %v507_v14  ;;  %632 = vmatpush.msra.mxu3 %v508_v15  ;;  %v476_v23 = vld [vmem:[%s2125_s7 + $0x518] sm:$0xff]  ;;  %v457_v24 = vld [vmem:[%s2125_s7 + $0x480] sm:$0xff]  ;;  %v458_v25 = vld [vmem:[%s2125_s7 + $0x488] sm:$0xff]  ;;  %p1894_p1 = por %p1893_p12, %p1892_p8 }
  0x64   : > { %573 = vmatpush.msra.mxu0 %v489_v16  ;;  %593 = vmatpush.msra.mxu1 %v490_v17  ;;  %v459_v26 = vld [vmem:[%s2125_s7 + $0x490] sm:$0xff]  ;;  %v460_v27 = vld [vmem:[%s2125_s7 + $0x498] sm:$0xff]  ;;  %v441_v28 = vld [vmem:[%s2125_s7 + $0x400] sm:$0xff]  ;;  %p1890_p2 = pneg %p1889_p7 }
  0x65   : > { %613 = vmatpush.msra.mxu2 %v491_v18  ;;  %633 = vmatpush.msra.mxu3 %v492_v19  ;;  %v442_v29 = vld [vmem:[%s2125_s7 + $0x408] sm:$0xff]  ;;  %v443_v30 = vld [vmem:[%s2125_s7 + $0x410] sm:$0xff]  ;;  %v444_v31 = vld [vmem:[%s2125_s7 + $0x418] sm:$0xff] }
  0x66   : > { %574 = vmatpush.msra.mxu0 %v473_v20  ;;  %594 = vmatpush.msra.mxu1 %v474_v21  ;;  %v425_v32 = vld [vmem:[%s2125_s7 + $0x380] sm:$0xff]  ;;  %v426_v33 = vld [vmem:[%s2125_s7 + $0x388] sm:$0xff]  ;;  %v427_v34 = vld [vmem:[%s2125_s7 + $0x390] sm:$0xff]  ;;  %p1895_p3 = pnand %p1894_p1, %p1890_p2 }
  0x67   : > { %614 = vmatpush.msra.mxu2 %v475_v22  ;;  %634 = vmatpush.msra.mxu3 %v476_v23  ;;  %v428_v35 = vld [vmem:[%s2125_s7 + $0x398] sm:$0xff]  ;;  %v409_v36 = vld [vmem:[%s2125_s7 + $0x300] sm:$0xff]  ;;  %v410_v37 = vld [vmem:[%s2125_s7 + $0x308] sm:$0xff] }
  0x68   : > { %575 = vmatpush.msra.mxu0 %v457_v24  ;;  %595 = vmatpush.msra.mxu1 %v458_v25  ;;  %v411_v38 = vld [vmem:[%s2125_s7 + $0x310] sm:$0xff]  ;;  %v412_v39 = vld [vmem:[%s2125_s7 + $0x318] sm:$0xff]  ;;  %v393_v40 = vld [vmem:[%s2125_s7 + $0x280] sm:$0xff] }
  0x69   : > { %615 = vmatpush.msra.mxu2 %v459_v26  ;;  %635 = vmatpush.msra.mxu3 %v460_v27  ;;  %v394_v41 = vld [vmem:[%s2125_s7 + $0x288] sm:$0xff]  ;;  %v395_v42 = vld [vmem:[%s2125_s7 + $0x290] sm:$0xff]  ;;  %v396_v43 = vld [vmem:[%s2125_s7 + $0x298] sm:$0xff] }
  0x6a   : > { %576 = vmatpush.msra.mxu0 %v441_v28  ;;  %596 = vmatpush.msra.mxu1 %v442_v29  ;;  %v377_v44 = vld [vmem:[%s2125_s7 + $0x200] sm:$0xff]  ;;  %v378_v45 = vld [vmem:[%s2125_s7 + $0x208] sm:$0xff]  ;;  %v379_v46 = vld [vmem:[%s2125_s7 + $0x210] sm:$0xff] }
  0x6b   : > { %616 = vmatpush.msra.mxu2 %v443_v30  ;;  %636 = vmatpush.msra.mxu3 %v444_v31  ;;  %v380_v47 = vld [vmem:[%s2125_s7 + $0x218] sm:$0xff]  ;;  %v361_v48 = vld [vmem:[%s2125_s7 + $0x180] sm:$0xff]  ;;  %v362_v49 = vld [vmem:[%s2125_s7 + $0x188] sm:$0xff] }
  0x6c   : > { %577 = vmatpush.msra.mxu0 %v425_v32  ;;  %597 = vmatpush.msra.mxu1 %v426_v33  ;;  %v363_v50 = vld [vmem:[%s2125_s7 + $0x190] sm:$0xff]  ;;  %v364_v51 = vld [vmem:[%s2125_s7 + $0x198] sm:$0xff]  ;;  %v345_v52 = vld [vmem:[%s2125_s7 + $0x100] sm:$0xff] }
  0x6d   : > { %617 = vmatpush.msra.mxu2 %v427_v34  ;;  %637 = vmatpush.msra.mxu3 %v428_v35  ;;  %v346_v53 = vld [vmem:[%s2125_s7 + $0x108] sm:$0xff]  ;;  %v347_v54 = vld [vmem:[%s2125_s7 + $0x110] sm:$0xff]  ;;  %v348_v55 = vld [vmem:[%s2125_s7 + $0x118] sm:$0xff] }
  0x6e   : > { %578 = vmatpush.msra.mxu0 %v409_v36  ;;  %598 = vmatpush.msra.mxu1 %v410_v37  ;;  %v329_v56 = vld [vmem:[%s2125_s7 + $0x80] sm:$0xff]  ;;  %v330_v57 = vld [vmem:[%s2125_s7 + $0x88] sm:$0xff]  ;;  %v331_v58 = vld [vmem:[%s2125_s7 + $0x90] sm:$0xff] }
  0x6f   : > { %618 = vmatpush.msra.mxu2 %v411_v38  ;;  %638 = vmatpush.msra.mxu3 %v412_v39  ;;  %v332_v59 = vld [vmem:[%s2125_s7 + $0x98] sm:$0xff]  ;;  %v313_v60 = vld [vmem:[%s2125_s7] sm:$0xff]  ;;  %v314_v61 = vld [vmem:[%s2125_s7 + $0x8] sm:$0xff] }
  0x70   : > { %579 = vmatpush.msra.mxu0 %v393_v40  ;;  %599 = vmatpush.msra.mxu1 %v394_v41  ;;  %v315_v62 = vld [vmem:[%s2125_s7 + $0x10] sm:$0xff]  ;;  %v316_v63 = vld [vmem:[%s2125_s7 + $0x18] sm:$0xff]  ;;  %v557_v1 = vld [vmem:[%s2125_s7 + $0x7a0] sm:$0xff] }
  0x71   : > { %619 = vmatpush.msra.mxu2 %v395_v42  ;;  %639 = vmatpush.msra.mxu3 %v396_v43  ;;  %v2205_v0 = vld [vmem:[#allocation2] sm:$0xff]  ;;  %v558_v2 = vld [vmem:[%s2125_s7 + $0x7a8] sm:$0xff]  ;;  %v559_v3 = vld [vmem:[%s2125_s7 + $0x7b0] sm:$0xff] }
  0x72   : > { %580 = vmatpush.msra.mxu0 %v377_v44  ;;  %600 = vmatpush.msra.mxu1 %v378_v45  ;;  %v560_v4 = vld [vmem:[%s2125_s7 + $0x7b8] sm:$0xff]  ;;  %v541_v5 = vld [vmem:[%s2125_s7 + $0x720] sm:$0xff]  ;;  %v542_v6 = vld [vmem:[%s2125_s7 + $0x728] sm:$0xff] }
  0x73   : > { %620 = vmatpush.msra.mxu2 %v379_v46  ;;  %640 = vmatpush.msra.mxu3 %v380_v47  ;;  %v543_v7 = vld [vmem:[%s2125_s7 + $0x730] sm:$0xff]  ;;  %v544_v8 = vld [vmem:[%s2125_s7 + $0x738] sm:$0xff]  ;;  %v525_v9 = vld [vmem:[%s2125_s7 + $0x6a0] sm:$0xff] }
  0x74   : > { %581 = vmatpush.msra.mxu0 %v361_v48  ;;  %601 = vmatpush.msra.mxu1 %v362_v49  ;;  %v526_v10 = vld [vmem:[%s2125_s7 + $0x6a8] sm:$0xff]  ;;  %v527_v11 = vld [vmem:[%s2125_s7 + $0x6b0] sm:$0xff]  ;;  %v528_v12 = vld [vmem:[%s2125_s7 + $0x6b8] sm:$0xff] }
  0x75   : > { %621 = vmatpush.msra.mxu2 %v363_v50  ;;  %641 = vmatpush.msra.mxu3 %v364_v51  ;;  %v509_v13 = vld [vmem:[%s2125_s7 + $0x620] sm:$0xff]  ;;  %v510_v14 = vld [vmem:[%s2125_s7 + $0x628] sm:$0xff]  ;;  %v511_v15 = vld [vmem:[%s2125_s7 + $0x630] sm:$0xff] }
  0x76   : > { %582 = vmatpush.msra.mxu0 %v345_v52  ;;  %602 = vmatpush.msra.mxu1 %v346_v53  ;;  %v512_v16 = vld [vmem:[%s2125_s7 + $0x638] sm:$0xff]  ;;  %v493_v17 = vld [vmem:[%s2125_s7 + $0x5a0] sm:$0xff]  ;;  %v494_v18 = vld [vmem:[%s2125_s7 + $0x5a8] sm:$0xff] }
  0x77   : > { %622 = vmatpush.msra.mxu2 %v347_v54  ;;  %642 = vmatpush.msra.mxu3 %v348_v55  ;;  %v495_v19 = vld [vmem:[%s2125_s7 + $0x5b0] sm:$0xff]  ;;  %v496_v20 = vld [vmem:[%s2125_s7 + $0x5b8] sm:$0xff]  ;;  %v477_v21 = vld [vmem:[%s2125_s7 + $0x520] sm:$0xff] }
  0x78   : > { %583 = vmatpush.msra.mxu0 %v329_v56  ;;  %603 = vmatpush.msra.mxu1 %v330_v57  ;;  %v478_v22 = vld [vmem:[%s2125_s7 + $0x528] sm:$0xff]  ;;  %v479_v23 = vld [vmem:[%s2125_s7 + $0x530] sm:$0xff]  ;;  %v480_v24 = vld [vmem:[%s2125_s7 + $0x538] sm:$0xff] }
  0x79   : > { %623 = vmatpush.msra.mxu2 %v331_v58  ;;  %643 = vmatpush.msra.mxu3 %v332_v59  ;;  %v461_v25 = vld [vmem:[%s2125_s7 + $0x4a0] sm:$0xff]  ;;  %v462_v26 = vld [vmem:[%s2125_s7 + $0x4a8] sm:$0xff]  ;;  %v463_v27 = vld [vmem:[%s2125_s7 + $0x4b0] sm:$0xff] }
  0x7a   : > { %584 = vmatpush.msra.mxu0 %v313_v60  ;;  %604 = vmatpush.msra.mxu1 %v314_v61  ;;  %v464_v28 = vld [vmem:[%s2125_s7 + $0x4b8] sm:$0xff]  ;;  %v445_v29 = vld [vmem:[%s2125_s7 + $0x420] sm:$0xff]  ;;  %v446_v30 = vld [vmem:[%s2125_s7 + $0x428] sm:$0xff] }
  0x7b   : > { %624 = vmatpush.msra.mxu2 %v315_v62  ;;  %644 = vmatpush.msra.mxu3 %v316_v63  ;;  %v447_v31 = vld [vmem:[%s2125_s7 + $0x430] sm:$0xff]  ;;  %v448_v32 = vld [vmem:[%s2125_s7 + $0x438] sm:$0xff]  ;;  %v429_v33 = vld [vmem:[%s2125_s7 + $0x3a0] sm:$0xff] }
  0x7c   : > { %585 = vmatmul.f32.vlgmr.msra.gmra.mxu0 %v2205_v0  ;;  %605 = vmatmul.f32.vlgmr.msra.gmra.mxu1 %v2205_v0  ;;  %v430_v34 = vld [vmem:[%s2125_s7 + $0x3a8] sm:$0xff]  ;;  %v431_v35 = vld [vmem:[%s2125_s7 + $0x3b0] sm:$0xff]  ;;  %v432_v36 = vld [vmem:[%s2125_s7 + $0x3b8] sm:$0xff] }
  0x7d   : > { %625 = vmatmul.f32.vlgmr.msra.gmra.mxu2 %v2205_v0  ;;  %645 = vmatmul.f32.vlgmr.msra.gmra.mxu3 %v2205_v0  ;;  %v413_v37 = vld [vmem:[%s2125_s7 + $0x320] sm:$0xff]  ;;  %v414_v38 = vld [vmem:[%s2125_s7 + $0x328] sm:$0xff]  ;;  %v415_v39 = vld [vmem:[%s2125_s7 + $0x330] sm:$0xff] }
  0x7e   : > { %649 = vmatpush.msrb.mxu0 %v557_v1  ;;  %669 = vmatpush.msrb.mxu1 %v558_v2  ;;  %v416_v40 = vld [vmem:[%s2125_s7 + $0x338] sm:$0xff]  ;;  %v397_v41 = vld [vmem:[%s2125_s7 + $0x2a0] sm:$0xff]  ;;  %v398_v42 = vld [vmem:[%s2125_s7 + $0x2a8] sm:$0xff] }
  0x7f   : > { %689 = vmatpush.msrb.mxu2 %v559_v3  ;;  %709 = vmatpush.msrb.mxu3 %v560_v4  ;;  %v399_v43 = vld [vmem:[%s2125_s7 + $0x2b0] sm:$0xff]  ;;  %v400_v44 = vld [vmem:[%s2125_s7 + $0x2b8] sm:$0xff]  ;;  %v381_v45 = vld [vmem:[%s2125_s7 + $0x220] sm:$0xff] }
  0x80   : > { %650 = vmatpush.msrb.mxu0 %v541_v5  ;;  %670 = vmatpush.msrb.mxu1 %v542_v6  ;;  %v382_v46 = vld [vmem:[%s2125_s7 + $0x228] sm:$0xff]  ;;  %v383_v47 = vld [vmem:[%s2125_s7 + $0x230] sm:$0xff]  ;;  %v384_v48 = vld [vmem:[%s2125_s7 + $0x238] sm:$0xff] }
  0x81   : > { %690 = vmatpush.msrb.mxu2 %v543_v7  ;;  %710 = vmatpush.msrb.mxu3 %v544_v8  ;;  %v365_v49 = vld [vmem:[%s2125_s7 + $0x1a0] sm:$0xff]  ;;  %v366_v50 = vld [vmem:[%s2125_s7 + $0x1a8] sm:$0xff]  ;;  %v367_v51 = vld [vmem:[%s2125_s7 + $0x1b0] sm:$0xff] }
  0x82   : > { %651 = vmatpush.msrb.mxu0 %v525_v9  ;;  %671 = vmatpush.msrb.mxu1 %v526_v10  ;;  %v368_v52 = vld [vmem:[%s2125_s7 + $0x1b8] sm:$0xff]  ;;  %v349_v53 = vld [vmem:[%s2125_s7 + $0x120] sm:$0xff]  ;;  %v350_v54 = vld [vmem:[%s2125_s7 + $0x128] sm:$0xff] }
  0x83   : > { %691 = vmatpush.msrb.mxu2 %v527_v11  ;;  %711 = vmatpush.msrb.mxu3 %v528_v12  ;;  %v351_v55 = vld [vmem:[%s2125_s7 + $0x130] sm:$0xff]  ;;  %v352_v56 = vld [vmem:[%s2125_s7 + $0x138] sm:$0xff]  ;;  %v333_v57 = vld [vmem:[%s2125_s7 + $0xa0] sm:$0xff] }
  0x84   : > { %652 = vmatpush.msrb.mxu0 %v509_v13  ;;  %672 = vmatpush.msrb.mxu1 %v510_v14  ;;  %v334_v58 = vld [vmem:[%s2125_s7 + $0xa8] sm:$0xff]  ;;  %v335_v59 = vld [vmem:[%s2125_s7 + $0xb0] sm:$0xff]  ;;  %v336_v60 = vld [vmem:[%s2125_s7 + $0xb8] sm:$0xff] }
  0x85   : > { %692 = vmatpush.msrb.mxu2 %v511_v15  ;;  %712 = vmatpush.msrb.mxu3 %v512_v16  ;;  %v317_v61 = vld [vmem:[%s2125_s7 + $0x20] sm:$0xff]  ;;  %v318_v62 = vld [vmem:[%s2125_s7 + $0x28] sm:$0xff]  ;;  %v319_v63 = vld [vmem:[%s2125_s7 + $0x30] sm:$0xff] }
  0x86   : > { %653 = vmatpush.msrb.mxu0 %v493_v17  ;;  %673 = vmatpush.msrb.mxu1 %v494_v18  ;;  %v320_v1 = vld [vmem:[%s2125_s7 + $0x38] sm:$0xff]  ;;  %v561_v2 = vld [vmem:[%s2125_s7 + $0x7c0] sm:$0xff]  ;;  %v562_v3 = vld [vmem:[%s2125_s7 + $0x7c8] sm:$0xff] }
  0x87   : > { %693 = vmatpush.msrb.mxu2 %v495_v19  ;;  %713 = vmatpush.msrb.mxu3 %v496_v20  ;;  %v563_v4 = vld [vmem:[%s2125_s7 + $0x7d0] sm:$0xff]  ;;  %v564_v5 = vld [vmem:[%s2125_s7 + $0x7d8] sm:$0xff]  ;;  %v545_v6 = vld [vmem:[%s2125_s7 + $0x740] sm:$0xff] }
  0x88   : > { %654 = vmatpush.msrb.mxu0 %v477_v21  ;;  %674 = vmatpush.msrb.mxu1 %v478_v22  ;;  %v546_v7 = vld [vmem:[%s2125_s7 + $0x748] sm:$0xff]  ;;  %v547_v8 = vld [vmem:[%s2125_s7 + $0x750] sm:$0xff]  ;;  %v548_v9 = vld [vmem:[%s2125_s7 + $0x758] sm:$0xff] }
  0x89   : > { %694 = vmatpush.msrb.mxu2 %v479_v23  ;;  %714 = vmatpush.msrb.mxu3 %v480_v24  ;;  %v529_v10 = vld [vmem:[%s2125_s7 + $0x6c0] sm:$0xff]  ;;  %v530_v11 = vld [vmem:[%s2125_s7 + $0x6c8] sm:$0xff]  ;;  %v531_v12 = vld [vmem:[%s2125_s7 + $0x6d0] sm:$0xff] }
  0x8a   : > { %655 = vmatpush.msrb.mxu0 %v461_v25  ;;  %675 = vmatpush.msrb.mxu1 %v462_v26  ;;  %v532_v13 = vld [vmem:[%s2125_s7 + $0x6d8] sm:$0xff]  ;;  %v513_v14 = vld [vmem:[%s2125_s7 + $0x640] sm:$0xff]  ;;  %v514_v15 = vld [vmem:[%s2125_s7 + $0x648] sm:$0xff] }
  0x8b   : > { %695 = vmatpush.msrb.mxu2 %v463_v27  ;;  %715 = vmatpush.msrb.mxu3 %v464_v28  ;;  %v515_v16 = vld [vmem:[%s2125_s7 + $0x650] sm:$0xff]  ;;  %v516_v17 = vld [vmem:[%s2125_s7 + $0x658] sm:$0xff]  ;;  %v497_v18 = vld [vmem:[%s2125_s7 + $0x5c0] sm:$0xff] }
  0x8c   : > { %656 = vmatpush.msrb.mxu0 %v445_v29  ;;  %676 = vmatpush.msrb.mxu1 %v446_v30  ;;  %v498_v19 = vld [vmem:[%s2125_s7 + $0x5c8] sm:$0xff]  ;;  %v499_v20 = vld [vmem:[%s2125_s7 + $0x5d0] sm:$0xff]  ;;  %v500_v21 = vld [vmem:[%s2125_s7 + $0x5d8] sm:$0xff] }
  0x8d   : > { %696 = vmatpush.msrb.mxu2 %v447_v31  ;;  %716 = vmatpush.msrb.mxu3 %v448_v32  ;;  %v481_v22 = vld [vmem:[%s2125_s7 + $0x540] sm:$0xff]  ;;  %v482_v23 = vld [vmem:[%s2125_s7 + $0x548] sm:$0xff]  ;;  %v483_v24 = vld [vmem:[%s2125_s7 + $0x550] sm:$0xff] }
  0x8e   : > { %657 = vmatpush.msrb.mxu0 %v429_v33  ;;  %677 = vmatpush.msrb.mxu1 %v430_v34  ;;  %v484_v25 = vld [vmem:[%s2125_s7 + $0x558] sm:$0xff]  ;;  %v465_v26 = vld [vmem:[%s2125_s7 + $0x4c0] sm:$0xff]  ;;  %v466_v27 = vld [vmem:[%s2125_s7 + $0x4c8] sm:$0xff] }
  0x8f   : > { %697 = vmatpush.msrb.mxu2 %v431_v35  ;;  %717 = vmatpush.msrb.mxu3 %v432_v36  ;;  %v467_v28 = vld [vmem:[%s2125_s7 + $0x4d0] sm:$0xff]  ;;  %v468_v29 = vld [vmem:[%s2125_s7 + $0x4d8] sm:$0xff]  ;;  %v449_v30 = vld [vmem:[%s2125_s7 + $0x440] sm:$0xff] }
  0x90   : > { %658 = vmatpush.msrb.mxu0 %v413_v37  ;;  %678 = vmatpush.msrb.mxu1 %v414_v38  ;;  %v450_v31 = vld [vmem:[%s2125_s7 + $0x448] sm:$0xff]  ;;  %v451_v32 = vld [vmem:[%s2125_s7 + $0x450] sm:$0xff]  ;;  %v452_v33 = vld [vmem:[%s2125_s7 + $0x458] sm:$0xff] }
  0x91   : > { %698 = vmatpush.msrb.mxu2 %v415_v39  ;;  %718 = vmatpush.msrb.mxu3 %v416_v40  ;;  %v433_v34 = vld [vmem:[%s2125_s7 + $0x3c0] sm:$0xff]  ;;  %v434_v35 = vld [vmem:[%s2125_s7 + $0x3c8] sm:$0xff]  ;;  %v435_v36 = vld [vmem:[%s2125_s7 + $0x3d0] sm:$0xff] }
  0x92   : > { %659 = vmatpush.msrb.mxu0 %v397_v41  ;;  %679 = vmatpush.msrb.mxu1 %v398_v42  ;;  %v436_v37 = vld [vmem:[%s2125_s7 + $0x3d8] sm:$0xff]  ;;  %v417_v38 = vld [vmem:[%s2125_s7 + $0x340] sm:$0xff]  ;;  %v418_v39 = vld [vmem:[%s2125_s7 + $0x348] sm:$0xff] }
  0x93   : > { %699 = vmatpush.msrb.mxu2 %v399_v43  ;;  %719 = vmatpush.msrb.mxu3 %v400_v44  ;;  %v419_v40 = vld [vmem:[%s2125_s7 + $0x350] sm:$0xff]  ;;  %v420_v41 = vld [vmem:[%s2125_s7 + $0x358] sm:$0xff]  ;;  %v401_v42 = vld [vmem:[%s2125_s7 + $0x2c0] sm:$0xff] }
  0x94   : > { %660 = vmatpush.msrb.mxu0 %v381_v45  ;;  %680 = vmatpush.msrb.mxu1 %v382_v46  ;;  %v402_v43 = vld [vmem:[%s2125_s7 + $0x2c8] sm:$0xff]  ;;  %v403_v44 = vld [vmem:[%s2125_s7 + $0x2d0] sm:$0xff]  ;;  %v404_v45 = vld [vmem:[%s2125_s7 + $0x2d8] sm:$0xff] }
  0x95   : > { %700 = vmatpush.msrb.mxu2 %v383_v47  ;;  %720 = vmatpush.msrb.mxu3 %v384_v48  ;;  %v385_v46 = vld [vmem:[%s2125_s7 + $0x240] sm:$0xff]  ;;  %v386_v47 = vld [vmem:[%s2125_s7 + $0x248] sm:$0xff]  ;;  %v387_v48 = vld [vmem:[%s2125_s7 + $0x250] sm:$0xff] }
  0x96   : > { %661 = vmatpush.msrb.mxu0 %v365_v49  ;;  %681 = vmatpush.msrb.mxu1 %v366_v50  ;;  %v388_v49 = vld [vmem:[%s2125_s7 + $0x258] sm:$0xff]  ;;  %v369_v50 = vld [vmem:[%s2125_s7 + $0x1c0] sm:$0xff] }
  0x97   : > { %701 = vmatpush.msrb.mxu2 %v367_v51  ;;  %721 = vmatpush.msrb.mxu3 %v368_v52  ;;  %v370_v51 = vld [vmem:[%s2125_s7 + $0x1c8] sm:$0xff]  ;;  %v371_v52 = vld [vmem:[%s2125_s7 + $0x1d0] sm:$0xff] }
  0x98   : > { %662 = vmatpush.msrb.mxu0 %v349_v53  ;;  %682 = vmatpush.msrb.mxu1 %v350_v54  ;;  %v372_v53 = vld [vmem:[%s2125_s7 + $0x1d8] sm:$0xff]  ;;  %v353_v54 = vld [vmem:[%s2125_s7 + $0x140] sm:$0xff] }
  0x99   : > { %702 = vmatpush.msrb.mxu2 %v351_v55  ;;  %722 = vmatpush.msrb.mxu3 %v352_v56  ;;  %v354_v55 = vld [vmem:[%s2125_s7 + $0x148] sm:$0xff]  ;;  %v355_v56 = vld [vmem:[%s2125_s7 + $0x150] sm:$0xff] }
  0x9a   : > { %663 = vmatpush.msrb.mxu0 %v333_v57  ;;  %683 = vmatpush.msrb.mxu1 %v334_v58  ;;  %v356_v57 = vld [vmem:[%s2125_s7 + $0x158] sm:$0xff]  ;;  %v337_v58 = vld [vmem:[%s2125_s7 + $0xc0] sm:$0xff] }
  0x9b   : > { %703 = vmatpush.msrb.mxu2 %v335_v59  ;;  %723 = vmatpush.msrb.mxu3 %v336_v60  ;;  %v338_v59 = vld [vmem:[%s2125_s7 + $0xc8] sm:$0xff]  ;;  %v339_v60 = vld [vmem:[%s2125_s7 + $0xd0] sm:$0xff] }
  0x9c   : > { %664 = vmatpush.msrb.mxu0 %v317_v61  ;;  %684 = vmatpush.msrb.mxu1 %v318_v62  ;;  %v340_v61 = vld [vmem:[%s2125_s7 + $0xd8] sm:$0xff]  ;;  %v321_v62 = vld [vmem:[%s2125_s7 + $0x40] sm:$0xff] }
  0x9d   : > { %704 = vmatpush.msrb.mxu2 %v319_v63  ;;  %724 = vmatpush.msrb.mxu3 %v320_v1  ;;  %v322_v63 = vld [vmem:[%s2125_s7 + $0x48] sm:$0xff]  ;;  %v323_v1 = vld [vmem:[%s2125_s7 + $0x50] sm:$0xff] }
  0x9e   : > { %665 = vmatmul.f32.vlgmr.msrb.gmra.mxu0 %v2205_v0  ;;  %685 = vmatmul.f32.vlgmr.msrb.gmra.mxu1 %v2205_v0 }
  0x9f   : > { %705 = vmatmul.f32.vlgmr.msrb.gmra.mxu2 %v2205_v0  ;;  %725 = vmatmul.f32.vlgmr.msrb.gmra.mxu3 %v2205_v0 }
  0xa0   : > { %729 = vmatpush.msra.mxu0 %v561_v2  ;;  %749 = vmatpush.msra.mxu1 %v562_v3  ;;  %v324_v2 = vld [vmem:[%s2125_s7 + $0x58] sm:$0xff]  ;;  %v565_v3 = vld [vmem:[%s2125_s7 + $0x7e0] sm:$0xff] }
  0xa1   : > { %769 = vmatpush.msra.mxu2 %v563_v4  ;;  %789 = vmatpush.msra.mxu3 %v564_v5  ;;  %v566_v4 = vld [vmem:[%s2125_s7 + $0x7e8] sm:$0xff]  ;;  %v567_v5 = vld [vmem:[%s2125_s7 + $0x7f0] sm:$0xff] }
  0xa2   : > { %730 = vmatpush.msra.mxu0 %v545_v6  ;;  %750 = vmatpush.msra.mxu1 %v546_v7  ;;  %v568_v6 = vld [vmem:[%s2125_s7 + $0x7f8] sm:$0xff]  ;;  %v549_v7 = vld [vmem:[%s2125_s7 + $0x760] sm:$0xff] }
  0xa3   : > { %770 = vmatpush.msra.mxu2 %v547_v8  ;;  %790 = vmatpush.msra.mxu3 %v548_v9  ;;  %v550_v8 = vld [vmem:[%s2125_s7 + $0x768] sm:$0xff]  ;;  %v551_v9 = vld [vmem:[%s2125_s7 + $0x770] sm:$0xff] }
  0xa4   : > { %731 = vmatpush.msra.mxu0 %v529_v10  ;;  %751 = vmatpush.msra.mxu1 %v530_v11  ;;  %v552_v10 = vld [vmem:[%s2125_s7 + $0x778] sm:$0xff]  ;;  %v533_v11 = vld [vmem:[%s2125_s7 + $0x6e0] sm:$0xff] }
  0xa5   : > { %771 = vmatpush.msra.mxu2 %v531_v12  ;;  %791 = vmatpush.msra.mxu3 %v532_v13  ;;  %v534_v12 = vld [vmem:[%s2125_s7 + $0x6e8] sm:$0xff]  ;;  %v535_v13 = vld [vmem:[%s2125_s7 + $0x6f0] sm:$0xff] }
  0xa6   : > { %732 = vmatpush.msra.mxu0 %v513_v14  ;;  %752 = vmatpush.msra.mxu1 %v514_v15  ;;  %v536_v14 = vld [vmem:[%s2125_s7 + $0x6f8] sm:$0xff]  ;;  %v517_v15 = vld [vmem:[%s2125_s7 + $0x660] sm:$0xff] }
  0xa7   : > { %772 = vmatpush.msra.mxu2 %v515_v16  ;;  %792 = vmatpush.msra.mxu3 %v516_v17  ;;  %v518_v16 = vld [vmem:[%s2125_s7 + $0x668] sm:$0xff]  ;;  %v519_v17 = vld [vmem:[%s2125_s7 + $0x670] sm:$0xff] }
  0xa8   : > { %733 = vmatpush.msra.mxu0 %v497_v18  ;;  %753 = vmatpush.msra.mxu1 %v498_v19  ;;  %v520_v18 = vld [vmem:[%s2125_s7 + $0x678] sm:$0xff]  ;;  %v501_v19 = vld [vmem:[%s2125_s7 + $0x5e0] sm:$0xff] }
  0xa9   : > { %773 = vmatpush.msra.mxu2 %v499_v20  ;;  %793 = vmatpush.msra.mxu3 %v500_v21  ;;  %v502_v20 = vld [vmem:[%s2125_s7 + $0x5e8] sm:$0xff]  ;;  %v503_v21 = vld [vmem:[%s2125_s7 + $0x5f0] sm:$0xff] }
  0xaa   : > { %734 = vmatpush.msra.mxu0 %v481_v22  ;;  %754 = vmatpush.msra.mxu1 %v482_v23  ;;  %v504_v22 = vld [vmem:[%s2125_s7 + $0x5f8] sm:$0xff]  ;;  %v485_v23 = vld [vmem:[%s2125_s7 + $0x560] sm:$0xff] }
  0xab   : > { %774 = vmatpush.msra.mxu2 %v483_v24  ;;  %794 = vmatpush.msra.mxu3 %v484_v25  ;;  %v486_v24 = vld [vmem:[%s2125_s7 + $0x568] sm:$0xff]  ;;  %v487_v25 = vld [vmem:[%s2125_s7 + $0x570] sm:$0xff] }
  0xac   : > { %735 = vmatpush.msra.mxu0 %v465_v26  ;;  %755 = vmatpush.msra.mxu1 %v466_v27  ;;  %v488_v26 = vld [vmem:[%s2125_s7 + $0x578] sm:$0xff]  ;;  %v469_v27 = vld [vmem:[%s2125_s7 + $0x4e0] sm:$0xff] }
  0xad   : > { %775 = vmatpush.msra.mxu2 %v467_v28  ;;  %795 = vmatpush.msra.mxu3 %v468_v29  ;;  %v470_v28 = vld [vmem:[%s2125_s7 + $0x4e8] sm:$0xff]  ;;  %v471_v29 = vld [vmem:[%s2125_s7 + $0x4f0] sm:$0xff] }
  0xae   : > { %736 = vmatpush.msra.mxu0 %v449_v30  ;;  %756 = vmatpush.msra.mxu1 %v450_v31  ;;  %v472_v30 = vld [vmem:[%s2125_s7 + $0x4f8] sm:$0xff]  ;;  %v453_v31 = vld [vmem:[%s2125_s7 + $0x460] sm:$0xff] }
  0xaf   : > { %776 = vmatpush.msra.mxu2 %v451_v32  ;;  %796 = vmatpush.msra.mxu3 %v452_v33  ;;  %v454_v32 = vld [vmem:[%s2125_s7 + $0x468] sm:$0xff]  ;;  %v455_v33 = vld [vmem:[%s2125_s7 + $0x470] sm:$0xff] }
  0xb0   : > { %737 = vmatpush.msra.mxu0 %v433_v34  ;;  %757 = vmatpush.msra.mxu1 %v434_v35  ;;  %v456_v34 = vld [vmem:[%s2125_s7 + $0x478] sm:$0xff]  ;;  %v437_v35 = vld [vmem:[%s2125_s7 + $0x3e0] sm:$0xff] }
  0xb1   : > { %777 = vmatpush.msra.mxu2 %v435_v36  ;;  %797 = vmatpush.msra.mxu3 %v436_v37  ;;  %v438_v36 = vld [vmem:[%s2125_s7 + $0x3e8] sm:$0xff]  ;;  %v439_v37 = vld [vmem:[%s2125_s7 + $0x3f0] sm:$0xff] }
  0xb2   : > { %738 = vmatpush.msra.mxu0 %v417_v38  ;;  %758 = vmatpush.msra.mxu1 %v418_v39  ;;  %v440_v38 = vld [vmem:[%s2125_s7 + $0x3f8] sm:$0xff]  ;;  %v421_v39 = vld [vmem:[%s2125_s7 + $0x360] sm:$0xff] }
  0xb3   : > { %778 = vmatpush.msra.mxu2 %v419_v40  ;;  %798 = vmatpush.msra.mxu3 %v420_v41  ;;  %v422_v40 = vld [vmem:[%s2125_s7 + $0x368] sm:$0xff]  ;;  %v423_v41 = vld [vmem:[%s2125_s7 + $0x370] sm:$0xff] }
  0xb4   : > { %739 = vmatpush.msra.mxu0 %v401_v42  ;;  %759 = vmatpush.msra.mxu1 %v402_v43  ;;  %v424_v42 = vld [vmem:[%s2125_s7 + $0x378] sm:$0xff]  ;;  %v405_v43 = vld [vmem:[%s2125_s7 + $0x2e0] sm:$0xff] }
  0xb5   : > { %779 = vmatpush.msra.mxu2 %v403_v44  ;;  %799 = vmatpush.msra.mxu3 %v404_v45  ;;  %v406_v44 = vld [vmem:[%s2125_s7 + $0x2e8] sm:$0xff]  ;;  %v407_v45 = vld [vmem:[%s2125_s7 + $0x2f0] sm:$0xff] }
  0xb6   : > { %740 = vmatpush.msra.mxu0 %v385_v46  ;;  %760 = vmatpush.msra.mxu1 %v386_v47  ;;  %v408_v46 = vld [vmem:[%s2125_s7 + $0x2f8] sm:$0xff]  ;;  %v389_v47 = vld [vmem:[%s2125_s7 + $0x260] sm:$0xff] }
  0xb7   : > { %780 = vmatpush.msra.mxu2 %v387_v48  ;;  %800 = vmatpush.msra.mxu3 %v388_v49  ;;  %v390_v48 = vld [vmem:[%s2125_s7 + $0x268] sm:$0xff]  ;;  %v391_v49 = vld [vmem:[%s2125_s7 + $0x270] sm:$0xff] }
  0xb8   : > { %741 = vmatpush.msra.mxu0 %v369_v50  ;;  %761 = vmatpush.msra.mxu1 %v370_v51  ;;  %v392_v50 = vld [vmem:[%s2125_s7 + $0x278] sm:$0xff]  ;;  %v373_v51 = vld [vmem:[%s2125_s7 + $0x1e0] sm:$0xff] }
  0xb9   : > { %781 = vmatpush.msra.mxu2 %v371_v52  ;;  %801 = vmatpush.msra.mxu3 %v372_v53  ;;  %v374_v52 = vld [vmem:[%s2125_s7 + $0x1e8] sm:$0xff]  ;;  %v375_v53 = vld [vmem:[%s2125_s7 + $0x1f0] sm:$0xff] }
  0xba   : > { %742 = vmatpush.msra.mxu0 %v353_v54  ;;  %762 = vmatpush.msra.mxu1 %v354_v55  ;;  %v376_v54 = vld [vmem:[%s2125_s7 + $0x1f8] sm:$0xff]  ;;  %v357_v55 = vld [vmem:[%s2125_s7 + $0x160] sm:$0xff] }
  0xbb   : > { %782 = vmatpush.msra.mxu2 %v355_v56  ;;  %802 = vmatpush.msra.mxu3 %v356_v57  ;;  %v358_v56 = vld [vmem:[%s2125_s7 + $0x168] sm:$0xff]  ;;  %v359_v57 = vld [vmem:[%s2125_s7 + $0x170] sm:$0xff] }
  0xbc   : > { %743 = vmatpush.msra.mxu0 %v337_v58  ;;  %763 = vmatpush.msra.mxu1 %v338_v59  ;;  %v360_v58 = vld [vmem:[%s2125_s7 + $0x178] sm:$0xff]  ;;  %v341_v59 = vld [vmem:[%s2125_s7 + $0xe0] sm:$0xff] }
  0xbd   : > { %783 = vmatpush.msra.mxu2 %v339_v60  ;;  %803 = vmatpush.msra.mxu3 %v340_v61  ;;  %v342_v60 = vld [vmem:[%s2125_s7 + $0xe8] sm:$0xff]  ;;  %v343_v61 = vld [vmem:[%s2125_s7 + $0xf0] sm:$0xff] }
  0xbe   : > { %744 = vmatpush.msra.mxu0 %v321_v62  ;;  %764 = vmatpush.msra.mxu1 %v322_v63  ;;  %v344_v62 = vld [vmem:[%s2125_s7 + $0xf8] sm:$0xff]  ;;  %v325_v63 = vld [vmem:[%s2125_s7 + $0x60] sm:$0xff] }
  0xbf   : > { %784 = vmatpush.msra.mxu2 %v323_v1  ;;  %804 = vmatpush.msra.mxu3 %v324_v2  ;;  %v326_v1 = vld [vmem:[%s2125_s7 + $0x68] sm:$0xff]  ;;  %v327_v2 = vld [vmem:[%s2125_s7 + $0x70] sm:$0xff] }
  0xc0   : > { %745 = vmatmul.f32.vlgmr.msra.gmra.mxu0 %v2205_v0  ;;  %765 = vmatmul.f32.vlgmr.msra.gmra.mxu1 %v2205_v0 }
  0xc1   : > { %785 = vmatmul.f32.vlgmr.msra.gmra.mxu2 %v2205_v0  ;;  %805 = vmatmul.f32.vlgmr.msra.gmra.mxu3 %v2205_v0 }
  0xc2   : > { %809 = vmatpush.msrb.mxu0 %v565_v3  ;;  %829 = vmatpush.msrb.mxu1 %v566_v4  ;;  %v328_v3 = vld [vmem:[%s2125_s7 + $0x78] sm:$0xff]  ;;  %v1951_v4 = vmov 8.0  }
  0xc3   : > { %849 = vmatpush.msrb.mxu2 %v567_v5  ;;  %869 = vmatpush.msrb.mxu3 %v568_v6  ;;  %1717 = vrcp.f32 %v1951_v4 }
  0xc4   : > { %810 = vmatpush.msrb.mxu0 %v549_v7  ;;  %830 = vmatpush.msrb.mxu1 %v550_v8 }
  0xc5   : > { %850 = vmatpush.msrb.mxu2 %v551_v9  ;;  %870 = vmatpush.msrb.mxu3 %v552_v10 }
  0xc6   : > { %811 = vmatpush.msrb.mxu0 %v533_v11  ;;  %831 = vmatpush.msrb.mxu1 %v534_v12 }
  0xc7   : > { %851 = vmatpush.msrb.mxu2 %v535_v13  ;;  %871 = vmatpush.msrb.mxu3 %v536_v14 }
  0xc8   : > { %812 = vmatpush.msrb.mxu0 %v517_v15  ;;  %832 = vmatpush.msrb.mxu1 %v518_v16 }
  0xc9   : > { %852 = vmatpush.msrb.mxu2 %v519_v17  ;;  %872 = vmatpush.msrb.mxu3 %v520_v18  ;;  %v1718_v5 = vpop.eup %1717 }
  0xca   : > { %813 = vmatpush.msrb.mxu0 %v501_v19  ;;  %833 = vmatpush.msrb.mxu1 %v502_v20  ;;  %v986_v6 = vmul.f32 8.0, %v1718_v5  ;;  %vm990_vm0 = vweird.f32 %v1718_v5 }
  0xcb   : > { %853 = vmatpush.msrb.mxu2 %v503_v21  ;;  %873 = vmatpush.msrb.mxu3 %v504_v22 }
  0xcc   : > { %814 = vmatpush.msrb.mxu0 %v485_v23  ;;  %834 = vmatpush.msrb.mxu1 %v486_v24  ;;  %v987_v7 = vsub.f32 1.0, %v986_v6 }
  0xcd   : > { %854 = vmatpush.msrb.mxu2 %v487_v25  ;;  %874 = vmatpush.msrb.mxu3 %v488_v26 }
  0xce   : > { %815 = vmatpush.msrb.mxu0 %v469_v27  ;;  %835 = vmatpush.msrb.mxu1 %v470_v28  ;;  %v988_v12 = vmul.f32 %v1718_v5, %v987_v7 }
  0xcf   : > { %855 = vmatpush.msrb.mxu2 %v471_v29  ;;  %875 = vmatpush.msrb.mxu3 %v472_v30 }
  0xd0   : > { %816 = vmatpush.msrb.mxu0 %v453_v31  ;;  %836 = vmatpush.msrb.mxu1 %v454_v32  ;;  %v989_v17 = vadd.f32 %v1718_v5, %v988_v12 }
  0xd1   : > { %856 = vmatpush.msrb.mxu2 %v455_v33  ;;  %876 = vmatpush.msrb.mxu3 %v456_v34 }
  0xd2   : > { %817 = vmatpush.msrb.mxu0 %v437_v35  ;;  %837 = vmatpush.msrb.mxu1 %v438_v36  ;;  %v2415_v25 = vsel %vm990_vm0, %v1718_v5, %v989_v17 }
  0xd3   : > { %857 = vmatpush.msrb.mxu2 %v439_v37  ;;  %877 = vmatpush.msrb.mxu3 %v440_v38 }
  0xd4   : > { %818 = vmatpush.msrb.mxu0 %v421_v39  ;;  %838 = vmatpush.msrb.mxu1 %v422_v40 }
  0xd5   : > { %858 = vmatpush.msrb.mxu2 %v423_v41  ;;  %878 = vmatpush.msrb.mxu3 %v424_v42 }
  0xd6   : > { %819 = vmatpush.msrb.mxu0 %v405_v43  ;;  %839 = vmatpush.msrb.mxu1 %v406_v44 }
  0xd7   : > { %859 = vmatpush.msrb.mxu2 %v407_v45  ;;  %879 = vmatpush.msrb.mxu3 %v408_v46 }
  0xd8   : > { %820 = vmatpush.msrb.mxu0 %v389_v47  ;;  %840 = vmatpush.msrb.mxu1 %v390_v48 }
  0xd9   : > { %860 = vmatpush.msrb.mxu2 %v391_v49  ;;  %880 = vmatpush.msrb.mxu3 %v392_v50 }
  0xda   : > { %821 = vmatpush.msrb.mxu0 %v373_v51  ;;  %841 = vmatpush.msrb.mxu1 %v374_v52 }
  0xdb   : > { %861 = vmatpush.msrb.mxu2 %v375_v53  ;;  %881 = vmatpush.msrb.mxu3 %v376_v54 }
  0xdc   : > { %822 = vmatpush.msrb.mxu0 %v357_v55  ;;  %842 = vmatpush.msrb.mxu1 %v358_v56 }
  0xdd   : > { %862 = vmatpush.msrb.mxu2 %v359_v57  ;;  %882 = vmatpush.msrb.mxu3 %v360_v58 }
  0xde   : > { %823 = vmatpush.msrb.mxu0 %v341_v59  ;;  %843 = vmatpush.msrb.mxu1 %v342_v60 }
  0xdf   : > { %863 = vmatpush.msrb.mxu2 %v343_v61  ;;  %883 = vmatpush.msrb.mxu3 %v344_v62 }
  0xe0   : > { %824 = vmatpush.msrb.mxu0 %v325_v63  ;;  %844 = vmatpush.msrb.mxu1 %v326_v1 }
  0xe1   : > { %864 = vmatpush.msrb.mxu2 %v327_v2  ;;  %884 = vmatpush.msrb.mxu3 %v328_v3 }
  0xe2   : > { %825 = vmatmul.f32.vlgmr.msrb.gmra.mxu0 %v2205_v0  ;;  %845 = vmatmul.f32.vlgmr.msrb.gmra.mxu1 %v2205_v0 }
  0xe3   : > { %865 = vmatmul.f32.vlgmr.msrb.gmra.mxu2 %v2205_v0  ;;  %885 = vmatmul.f32.vlgmr.msrb.gmra.mxu3 %v2205_v0 }
  0xf9   : > { %v586_v8 = vpop.f32.mrf.mxu0  ;;  %v606_v9 = vpop.f32.mrf.mxu1 }
  0xfa   : > { %v889_v10 = vrot.slane %v586_v8, 4  ;;  %v895_v11 = vrot.slane %v606_v9, 4 }
  0xfc   : > { %v890_v13 = vadd.f32 %v889_v10, %v586_v8  ;;  %v896_v14 = vadd.f32 %v895_v11, %v606_v9 }
  0xfe   : > { %v891_v15 = vrot.slane %v890_v13, 2  ;;  %v897_v16 = vrot.slane %v896_v14, 2 }
 0x100   : > { %v892_v18 = vadd.f32 %v891_v15, %v890_v13  ;;  %v898_v19 = vadd.f32 %v897_v16, %v896_v14  ;;  %v626_v20 = vpop.f32.mrf.mxu2  ;;  %v646_v0 = vpop.f32.mrf.mxu3 }
 0x101   : > { %v901_v21 = vrot.slane %v626_v20, 4  ;;  %v907_v22 = vrot.slane %v646_v0, 4 }
 0x102   : > { %v893_v23 = vrot.slane %v892_v18, 1  ;;  %v899_v24 = vrot.slane %v898_v19, 1 }
 0x103   : > { %v902_v26 = vadd.f32 %v901_v21, %v626_v20  ;;  %v908_v27 = vadd.f32 %v907_v22, %v646_v0 }
 0x104   : > { %v894_v28 = vadd.f32 %v893_v23, %v892_v18  ;;  %v900_v29 = vadd.f32 %v899_v24, %v898_v19  ;;  %v2448_v18 = vld [vmem:[%s2132_s13] sm:$0xff] }
 0x105   : > { %v903_v30 = vrot.slane %v902_v26, 2  ;;  %v909_v31 = vrot.slane %v908_v27, 2  ;;  %v2451_v19 = vld [vmem:[%s2135_s1] sm:$0xff] }
 0x106   : > { %v992_v32 = vmul.f32 %v2415_v25, %v894_v28  ;;  %v993_v33 = vmul.f32 %v2415_v25, %v900_v29 }
 0x107   : > { %v904_v34 = vadd.f32 %v903_v30, %v902_v26  ;;  %v910_v35 = vadd.f32 %v909_v31, %v908_v27  ;;  %v1348_v26 = vperm.slane %v2448_v18, 0  ;;  %v1400_v27 = vperm.slane %v2451_v19, 0 }
 0x108   : > { %v2419_v36 = vsub.f32 %v586_v8, %v992_v32  ;;  %v2421_v37 = vsub.f32 %v606_v9, %v993_v33  ;;  %v1349_v31 = vperm.slane %v2448_v18, 1  ;;  %v1401_v32 = vperm.slane %v2451_v19, 1 }
 0x109   : > { %v905_v38 = vrot.slane %v904_v34, 1  ;;  %v911_v39 = vrot.slane %v910_v35, 1 }
 0x10a   : > { %v1024_v40 = vmul.f32 %v2419_v36, %v2419_v36  ;;  %v1025_v41 = vmul.f32 %v2421_v37, %v2421_v37 }
 0x10b   : > { %v906_v42 = vadd.f32 %v905_v38, %v904_v34  ;;  %v912_v43 = vadd.f32 %v911_v39, %v910_v35 }
 0x10c   : > { %v1040_v44 = vrot.slane %v1024_v40, 4  ;;  %v1046_v45 = vrot.slane %v1025_v41, 4 }
 0x10d   : > { %v994_v46 = vmul.f32 %v2415_v25, %v906_v42  ;;  %v995_v47 = vmul.f32 %v2415_v25, %v912_v43 }
 0x10e   : > { %v1041_v48 = vadd.f32 %v1040_v44, %v1024_v40  ;;  %v1047_v49 = vadd.f32 %v1046_v45, %v1025_v41  ;;  %v1350_v40 = vperm.slane %v2448_v18, 2  ;;  %v1402_v41 = vperm.slane %v2451_v19, 2 }
 0x10f   : > { %v2429_v50 = vsub.f32 %v626_v20, %v994_v46  ;;  %v2431_v51 = vsub.f32 %v646_v0, %v995_v47 }
 0x110   : > { %v1042_v52 = vrot.slane %v1041_v48, 2  ;;  %v1048_v53 = vrot.slane %v1047_v49, 2 }
 0x111   : > { %v1026_v54 = vmul.f32 %v2429_v50, %v2429_v50  ;;  %v1027_v55 = vmul.f32 %v2431_v51, %v2431_v51 }
 0x112   : > { %v1043_v56 = vadd.f32 %v1042_v52, %v1041_v48  ;;  %v1049_v57 = vadd.f32 %v1048_v53, %v1047_v49  ;;  %v1351_v49 = vperm.slane %v2448_v18, 3 }
 0x113   : > { %v1052_v58 = vrot.slane %v1026_v54, 4  ;;  %v1058_v59 = vrot.slane %v1027_v55, 4 }
 0x114   : > { %v1044_v60 = vrot.slane %v1043_v56, 1  ;;  %v1050_v61 = vrot.slane %v1049_v57, 1 }
 0x115   : > { %v1053_v62 = vadd.f32 %v1052_v58, %v1026_v54  ;;  %v1059_v63 = vadd.f32 %v1058_v59, %v1027_v55 }
 0x116   : > { %v1045_v1 = vadd.f32 %v1044_v60, %v1043_v56  ;;  %v1051_v2 = vadd.f32 %v1050_v61, %v1049_v57 }
 0x117   : > { %v1054_v3 = vrot.slane %v1053_v62, 2  ;;  %v1060_v4 = vrot.slane %v1059_v63, 2 }
 0x118   : > { %v1136_v5 = vmul.f32 %v1045_v1, %v2415_v25  ;;  %v1137_v6 = vmul.f32 %v1051_v2, %v2415_v25 }
 0x119   : > { %v1055_v7 = vadd.f32 %v1054_v3, %v1053_v62  ;;  %v1061_v8 = vadd.f32 %v1060_v4, %v1059_v63 }
 0x11a   : > { %v1152_v9 = vadd.f32 1e-05, %v1136_v5  ;;  %v2439_v10 = vadd.f32 1e-05, %v1137_v6 }
 0x11b   : > { %v1056_v11 = vrot.slane %v1055_v7, 1  ;;  %v1062_v12 = vrot.slane %v1061_v8, 1  ;;  %v2441_v13 = vpop.f32.mrf.mxu0  ;;  %v2443_v14 = vpop.f32.mrf.mxu1 }
 0x11c   : > { %1719 = vrsqrt.f32 %v1152_v9  ;;  %v913_v15 = vrot.slane %v2441_v13, 4  ;;  %v919_v0 = vrot.slane %v2443_v14, 4  ;;  %vm1174_vm1 = vweird.f32 %v1152_v9 }
 0x11d   : > { %1721 = vrsqrt.f32 %v2439_v10  ;;  %v1057_v16 = vadd.f32 %v1056_v11, %v1055_v7  ;;  %v1063_v17 = vadd.f32 %v1062_v12, %v1061_v8  ;;  %vm1184_vm2 = vweird.f32 %v2439_v10 }
 0x11e   : > { %v914_v20 = vadd.f32 %v913_v15, %v2441_v13  ;;  %v920_v24 = vadd.f32 %v919_v0, %v2443_v14 }
 0x11f   : > { %v1138_v21 = vmul.f32 %v1057_v16, %v2415_v25  ;;  %v1139_v22 = vmul.f32 %v1063_v17, %v2415_v25 }
 0x120   : > { %v915_v23 = vrot.slane %v914_v20, 2  ;;  %v921_v34 = vrot.slane %v920_v24, 2 }
 0x121   : > { %v2460_v28 = vadd.f32 1e-05, %v1138_v21  ;;  %v2462_v29 = vadd.f32 1e-05, %v1139_v22 }
 0x122   : > { %v1720_v30 = vpop.eup %1719  ;;  %v916_v33 = vadd.f32 %v915_v23, %v914_v20  ;;  %v2466_v35 = vpop.f32.mrf.mxu2  ;;  %v922_v46 = vadd.f32 %v921_v34, %v920_v24 }
 0x123   : > { %v1722_v38 = vpop.eup %1721  ;;  %v1169_v39 = vmul.f32 %v1720_v30, %v1152_v9  ;;  %1723 = vrsqrt.f32 %v2460_v28  ;;  %v2471_v42 = vpop.f32.mrf.mxu3  ;;  %v925_v47 = vrot.slane %v2466_v35, 4  ;;  %vm1175_vm3 = vweird.f32 %v1720_v30 }
 0x124   : > { %v1179_v43 = vmul.f32 %v1722_v38, %v2439_v10  ;;  %1725 = vrsqrt.f32 %v2462_v29  ;;  %v917_v45 = vrot.slane %v916_v33, 1  ;;  %v931_v52 = vrot.slane %v2471_v42, 4  ;;  %vm2485_vm6 = vmor %vm1174_vm1, %vm1175_vm3 }
 0x125   : > { %v1170_v44 = vmul.f32 %v1720_v30, %v1169_v39  ;;  %v923_v55 = vrot.slane %v922_v46, 1  ;;  %v926_v56 = vadd.f32 %v925_v47, %v2466_v35  ;;  %vm1185_vm4 = vweird.f32 %v1722_v38 }
 0x126   : > { %v1180_v48 = vmul.f32 %v1722_v38, %v1179_v43  ;;  %v918_v54 = vadd.f32 %v917_v45, %v916_v33  ;;  %vm1194_vm5 = vweird.f32 %v2460_v28  ;;  %v932_v58 = vadd.f32 %v931_v52, %v2471_v42  ;;  %vm2494_vm8 = vmor %vm1184_vm2, %vm1185_vm4 }
 0x127   : > { %v1171_v53 = vmul.f32 0.5, %v1170_v44  ;;  %v924_v62 = vadd.f32 %v923_v55, %v922_v46  ;;  %v927_v63 = vrot.slane %v926_v56, 2  ;;  %vm1204_vm7 = vweird.f32 %v2462_v29 }
 0x128   : > { %v1181_v57 = vmul.f32 0.5, %v1180_v48  ;;  %v996_v61 = vmul.f32 %v2415_v25, %v918_v54  ;;  %v933_v5 = vrot.slane %v932_v58, 2 }
 0x129   : > { %v1724_v59 = vpop.eup %1723  ;;  %v1172_v60 = vsub.f32 1.5, %v1171_v53  ;;  %v997_v15 = vmul.f32 %v2415_v25, %v924_v62  ;;  %v928_v16 = vadd.f32 %v927_v63, %v926_v56  ;;  %v1403_v53 = vperm.slane %v2451_v19, 3 }
 0x12a   : > { %v1726_v1 = vpop.eup %1725  ;;  %v1182_v3 = vsub.f32 1.5, %v1181_v57  ;;  %v1189_v4 = vmul.f32 %v1724_v59, %v2460_v28  ;;  %vm1195_vm9 = vweird.f32 %v1724_v59  ;;  %v2500_v9 = vsub.f32 %v2441_v13, %v996_v61 }
 0x12b   : > { %v1173_v6 = vmul.f32 %v1720_v30, %v1172_v60  ;;  %v1199_v8 = vmul.f32 %v1726_v1, %v2462_v29  ;;  %v934_v0 = vadd.f32 %v933_v5, %v932_v58  ;;  %v2511_v23 = vsub.f32 %v2443_v14, %v997_v15  ;;  %vm1196_vm11 = vmor %vm1194_vm5, %vm1195_vm9 }
 0x12c   : > { %v1183_v11 = vmul.f32 %v1722_v38, %v1182_v3  ;;  %v1190_v12 = vmul.f32 %v1724_v59, %v1189_v4  ;;  %v1028_v20 = vmul.f32 %v2500_v9, %v2500_v9  ;;  %v929_v39 = vrot.slane %v928_v16, 1 }
 0x12d   : > { %v1177_v17 = vsel %vm2485_vm6, %v1720_v30, %v1173_v6  ;;  %v1200_v10 = vmul.f32 %v1726_v1, %v1199_v8  ;;  %vm1205_vm10 = vweird.f32 %v1726_v1  ;;  %v935_v45 = vrot.slane %v934_v0, 1 }
 0x12e   : > { %v1328_v21 = vmul.f32 %v1177_v17, %v2419_v36  ;;  %v1187_v13 = vsel %vm2494_vm8, %v1722_v38, %v1183_v11  ;;  %v1191_v22 = vmul.f32 0.5, %v1190_v12  ;;  %v1064_v34 = vrot.slane %v1028_v20, 4  ;;  %vm1206_vm12 = vmor %vm1204_vm7, %vm1205_vm10 }
 0x12f   : > { %v1329_v24 = vmul.f32 %v1187_v13, %v2421_v37  ;;  %v1201_v33 = vmul.f32 0.5, %v1200_v10  ;;  %v1029_v36 = vmul.f32 %v2511_v23, %v2511_v23  ;;  %v930_v48 = vadd.f32 %v929_v39, %v928_v16 }
 0x130   : > { %v1380_v30 = vmul.f32 %v1348_v26, %v1328_v21  ;;  %v1192_v43 = vsub.f32 1.5, %v1191_v22  ;;  %v1065_v14 = vadd.f32 %v1064_v34, %v1028_v20  ;;  %v936_v29 = vadd.f32 %v935_v45, %v934_v0 }
 0x131   : > { %v1381_v38 = vmul.f32 %v1349_v31, %v1329_v24  ;;  %v1202_v44 = vsub.f32 1.5, %v1201_v33  ;;  %v1070_v47 = vrot.slane %v1029_v36, 4  ;;  %v998_v56 = vmul.f32 %v2415_v25, %v930_v48 }
 0x132   : > { %v1432_v37 = vadd.f32 %v1400_v27, %v1380_v30  ;;  %v1193_v46 = vmul.f32 %v1724_v59, %v1192_v43  ;;  %v1066_v31 = vrot.slane %v1065_v14, 2 }
 0x133   : > { %v1433_v26 = vadd.f32 %v1401_v32, %v1381_v38  ;;  %v1203_v52 = vmul.f32 %v1726_v1, %v1202_v44  ;;  %v1071_v27 = vadd.f32 %v1070_v47, %v1029_v36  ;;  %v2539_v61 = vsub.f32 %v2466_v35, %v998_v56 }
 0x134   : > { %v1448_v54 = vmax.f32 %v1432_v37, 0.0  ;;  %v1197_v55 = vsel %vm1196_vm11, %v1724_v59, %v1193_v46  ;;  %v1067_v60 = vadd.f32 %v1066_v31, %v1065_v14 }
 0x135   : > { %v1449_v57 = vmax.f32 %v1433_v26, 0.0  ;;  %v1330_v32 = vmul.f32 %v1197_v55, %v2429_v50  ;;  %v1207_v58 = vsel %vm1206_vm12, %v1726_v1, %v1203_v52  ;;  %v1072_v59 = vrot.slane %v1071_v27, 2 }
 0x136   : > { %1464 = vst [vmem:[%s2534_s25] sm:$0xff] %v1448_v54  ;;  %v1331_v28 = vmul.f32 %v1207_v58, %v2431_v51  ;;  %v1068_v63 = vrot.slane %v1067_v60, 1  ;;  %v1030_v2 = vmul.f32 %v2539_v61, %v2539_v61  ;;  %v999_v51 = vmul.f32 %v2415_v25, %v936_v29 }
 0x137   : > { %1465 = vst [vmem:[%s2534_s25 + $0x8] sm:$0xff] %v1449_v57  ;;  %v1382_v62 = vmul.f32 %v1350_v40, %v1330_v32  ;;  %v1073_v1 = vadd.f32 %v1072_v59, %v1071_v27 }
 0x138   : > { %v1383_v50 = vmul.f32 %v1351_v49, %v1331_v28  ;;  %v1069_v3 = vadd.f32 %v1068_v63, %v1067_v60  ;;  %v1076_v6 = vrot.slane %v1030_v2, 4  ;;  %v2552_v40 = vsub.f32 %v2471_v42, %v999_v51 }
 0x139   : > { %v1434_v35 = vadd.f32 %v1402_v41, %v1382_v62  ;;  %v1074_v5 = vrot.slane %v1073_v1, 1 }
 0x13a   : > { %v1435_v4 = vadd.f32 %v1403_v53, %v1383_v50  ;;  %v1140_v49 = vmul.f32 %v1069_v3, %v2415_v25  ;;  %v1077_v12 = vadd.f32 %v1076_v6, %v1030_v2  ;;  %v1031_v16 = vmul.f32 %v2552_v40, %v2552_v40 }
 0x13b   : > { %v1450_v7 = vmax.f32 %v1434_v35, 0.0  ;;  %v1075_v11 = vadd.f32 %v1074_v5, %v1073_v1  ;;  %v1352_v53 = vperm.slane %v2448_v18, 4 }
 0x13c   : > { %v1451_v8 = vmax.f32 %v1435_v4, 0.0  ;;  %v1156_v15 = vadd.f32 1e-05, %v1140_v49  ;;  %v1078_v20 = vrot.slane %v1077_v12, 2  ;;  %v1082_v42 = vrot.slane %v1031_v16, 4 }
 0x13d   : > { %1466 = vst [vmem:[%s2534_s25 + $0x10] sm:$0xff] %v1450_v7  ;;  %v746_v41 = vpop.f32.mrf.mxu0  ;;  %v766_v17 = vpop.f32.mrf.mxu1  ;;  %v1141_v10 = vmul.f32 %v1075_v11, %v2415_v25 }
 0x13e   : > { %1467 = vst [vmem:[%s2534_s25 + $0x18] sm:$0xff] %v1451_v8  ;;  %v937_v0 = vrot.slane %v746_v41, 4  ;;  %1727 = vrsqrt.f32 %v1156_v15  ;;  %v943_v21 = vrot.slane %v766_v17, 4  ;;  %v1079_v22 = vadd.f32 %v1078_v20, %v1077_v12 }
 0x13f   : > { %v2560_v13 = vadd.f32 1e-05, %v1141_v10  ;;  %v1083_v33 = vadd.f32 %v1082_v42, %v1031_v16  ;;  %vm1214_vm13 = vweird.f32 %v1156_v15  ;;  %v1404_v16 = vperm.slane %v2451_v19, 4 }
 0x140   : > { %v938_v24 = vadd.f32 %v937_v0, %v746_v41  ;;  %v944_v34 = vadd.f32 %v943_v21, %v766_v17  ;;  %v1080_v39 = vrot.slane %v1079_v22, 1 }
 0x141   : > { %1729 = vrsqrt.f32 %v2560_v13  ;;  %v1084_v43 = vrot.slane %v1083_v33, 2  ;;  %vm1224_vm14 = vweird.f32 %v2560_v13 }
 0x142   : > { %v939_v30 = vrot.slane %v938_v24, 2  ;;  %v945_v36 = vrot.slane %v944_v34, 2  ;;  %v1081_v38 = vadd.f32 %v1080_v39, %v1079_v22 }
 0x143   : > { %v1085_v46 = vadd.f32 %v1084_v43, %v1083_v33 }
 0x144   : > { %v940_v44 = vadd.f32 %v939_v30, %v938_v24  ;;  %v2563_v14 = vpop.f32.mrf.mxu2  ;;  %v2565_v45 = vpop.f32.mrf.mxu3  ;;  %v946_v47 = vadd.f32 %v945_v36, %v944_v34  ;;  %v1142_v31 = vmul.f32 %v1081_v38, %v2415_v25  ;;  %v1405_v30 = vperm.slane %v2451_v19, 5 }
 0x145   : > { %v1728_v37 = vpop.eup %1727  ;;  %v949_v48 = vrot.slane %v2563_v14, 4  ;;  %v955_v26 = vrot.slane %v2565_v45, 4  ;;  %v1086_v55 = vrot.slane %v1085_v46, 1 }
 0x146   : > { %v1209_v52 = vmul.f32 %v1728_v37, %v1156_v15  ;;  %v941_v54 = vrot.slane %v940_v44, 1  ;;  %v947_v27 = vrot.slane %v946_v47, 1  ;;  %v2572_v58 = vadd.f32 1e-05, %v1142_v31 }
 0x147   : > { %v950_v56 = vadd.f32 %v949_v48, %v2563_v14  ;;  %v1730_v57 = vpop.eup %1729  ;;  %v956_v28 = vadd.f32 %v955_v26, %v2565_v45  ;;  %v1087_v29 = vadd.f32 %v1086_v55, %v1085_v46  ;;  %vm1215_vm15 = vweird.f32 %v1728_v37 }
 0x148   : > { %v1210_v32 = vmul.f32 %v1728_v37, %v1209_v52  ;;  %v942_v60 = vadd.f32 %v941_v54, %v940_v44  ;;  %v1219_v59 = vmul.f32 %v1730_v57, %v2560_v13  ;;  %v948_v62 = vadd.f32 %v947_v27, %v946_v47  ;;  %vm2584_vm1 = vmor %vm1214_vm13, %vm1215_vm15 }
 0x149   : > { %1731 = vrsqrt.f32 %v2572_v58  ;;  %v1143_v2 = vmul.f32 %v1087_v29, %v2415_v25  ;;  %v951_v35 = vrot.slane %v950_v56, 2  ;;  %vm1225_vm0 = vweird.f32 %v1730_v57 }
 0x14a   : > { %v1211_v63 = vmul.f32 0.5, %v1210_v32  ;;  %v1000_v50 = vmul.f32 %v2415_v25, %v942_v60  ;;  %v1220_v1 = vmul.f32 %v1730_v57, %v1219_v59  ;;  %v1001_v51 = vmul.f32 %v2415_v25, %v948_v62  ;;  %vm2604_vm2 = vmor %vm1224_vm14, %vm1225_vm0 }
 0x14b   : > { %v957_v5 = vrot.slane %v956_v28, 2  ;;  %v2588_v49 = vadd.f32 1e-05, %v1143_v2  ;;  %v952_v11 = vadd.f32 %v951_v35, %v950_v56  ;;  %v1353_v15 = vperm.slane %v2448_v18, 5 }
 0x14c   : > { %v1212_v3 = vsub.f32 1.5, %v1211_v63  ;;  %v2581_v4 = vsub.f32 %v746_v41, %v1000_v50  ;;  %v1221_v7 = vmul.f32 0.5, %v1220_v1  ;;  %v2590_v8 = vsub.f32 %v766_v17, %v1001_v51 }
 0x14d   : > { %v958_v41 = vadd.f32 %v957_v5, %v956_v28  ;;  %1733 = vrsqrt.f32 %v2588_v49  ;;  %v953_v24 = vrot.slane %v952_v11, 1  ;;  %v1354_v48 = vperm.slane %v2448_v18, 6 }
 0x14e   : > { %v1213_v12 = vmul.f32 %v1728_v37, %v1212_v3  ;;  %v1032_v10 = vmul.f32 %v2581_v4, %v2581_v4  ;;  %v1222_v20 = vsub.f32 1.5, %v1221_v7  ;;  %v1033_v0 = vmul.f32 %v2590_v8, %v2590_v8 }
 0x14f   : > { %v1732_v42 = vpop.eup %1731  ;;  %v959_v33 = vrot.slane %v958_v41, 1  ;;  %v954_v44 = vadd.f32 %v953_v24, %v952_v11  ;;  %vm1234_vm3 = vweird.f32 %v2572_v58  ;;  %v1406_v2 = vperm.slane %v2451_v19, 6 }
 0x150   : > { %v1217_v17 = vsel %vm2584_vm1, %v1728_v37, %v1213_v12  ;;  %v1088_v22 = vrot.slane %v1032_v10, 4  ;;  %v1223_v39 = vmul.f32 %v1730_v57, %v1222_v20  ;;  %v1229_v43 = vmul.f32 %v1732_v42, %v2572_v58 }
 0x151   : > { %v1332_v34 = vmul.f32 %v1217_v17, %v2500_v9  ;;  %v1094_v38 = vrot.slane %v1033_v0, 4  ;;  %v960_v37 = vadd.f32 %v959_v33, %v958_v41  ;;  %v1002_v31 = vmul.f32 %v2415_v25, %v954_v44 }
 0x152   : > { %v1089_v36 = vadd.f32 %v1088_v22, %v1032_v10  ;;  %v1227_v13 = vsel %vm2604_vm2, %v1730_v57, %v1223_v39  ;;  %v1230_v47 = vmul.f32 %v1732_v42, %v1229_v43  ;;  %vm1235_vm4 = vweird.f32 %v1732_v42 }
 0x153   : > { %v1384_v46 = vmul.f32 %v1352_v53, %v1332_v34  ;;  %v1333_v26 = vmul.f32 %v1227_v13, %v2511_v23  ;;  %v1095_v9 = vadd.f32 %v1094_v38, %v1033_v0  ;;  %v1734_v54 = vpop.eup %1733  ;;  %v1003_v53 = vmul.f32 %v2415_v25, %v960_v37  ;;  %vm1236_vm5 = vmor %vm1234_vm3, %vm1235_vm4 }
 0x154   : > { %v1090_v52 = vrot.slane %v1089_v36, 2  ;;  %v1231_v27 = vmul.f32 0.5, %v1230_v47  ;;  %v1239_v57 = vmul.f32 %v1734_v54, %v2588_v49  ;;  %v2620_v59 = vsub.f32 %v2563_v14, %v1002_v31 }
 0x155   : > { %v1436_v55 = vadd.f32 %v1404_v16, %v1384_v46  ;;  %v1385_v56 = vmul.f32 %v1353_v15, %v1333_v26  ;;  %v1096_v23 = vrot.slane %v1095_v9, 2  ;;  %v2623_v50 = vsub.f32 %v2565_v45, %v1003_v53 }
 0x156   : > { %v1091_v32 = vadd.f32 %v1090_v52, %v1089_v36  ;;  %v1232_v28 = vsub.f32 1.5, %v1231_v27  ;;  %v1240_v62 = vmul.f32 %v1734_v54, %v1239_v57  ;;  %v1034_v35 = vmul.f32 %v2620_v59, %v2620_v59  ;;  %v2660_v52 = vld [vmem:[%s2132_s13 + $0x8] sm:$0xff] }
 0x157   : > { %v1452_v60 = vmax.f32 %v1436_v55, 0.0  ;;  %v1437_v29 = vadd.f32 %v1405_v30, %v1385_v56  ;;  %v1097_v51 = vadd.f32 %v1096_v23, %v1095_v9  ;;  %vm1244_vm6 = vweird.f32 %v2588_v49  ;;  %v2668_v57 = vld [vmem:[%s2135_s1 + $0x8] sm:$0xff] }
 0x158   : > { %v1092_v63 = vrot.slane %v1091_v32, 1  ;;  %v1233_v1 = vmul.f32 %v1732_v42, %v1232_v28  ;;  %v1241_v14 = vmul.f32 0.5, %v1240_v62  ;;  %vm1245_vm7 = vweird.f32 %v1734_v54 }
 0x159   : > { %1468 = vst [vmem:[%s2534_s25 + $0x20] sm:$0xff] %v1452_v60  ;;  %v1453_v3 = vmax.f32 %v1437_v29, 0.0  ;;  %v1098_v45 = vrot.slane %v1097_v51, 1  ;;  %v1100_v7 = vrot.slane %v1034_v35, 4  ;;  %v1035_v10 = vmul.f32 %v2623_v50, %v2623_v50  ;;  %vm1246_vm8 = vmor %vm1244_vm6, %vm1245_vm7 }
 0x15a   : > { %v1093_v5 = vadd.f32 %v1092_v63, %v1091_v32  ;;  %v1237_v6 = vsel %vm1236_vm5, %v1732_v42, %v1233_v1  ;;  %v1242_v12 = vsub.f32 1.5, %v1241_v14  ;;  %v1355_v42 = vperm.slane %v2448_v18, 7 }
 0x15b   : > { %1469 = vst [vmem:[%s2534_s25 + $0x28] sm:$0xff] %v1453_v3  ;;  %v1334_v11 = vmul.f32 %v1237_v6, %v2539_v61  ;;  %v1099_v41 = vadd.f32 %v1098_v45, %v1097_v51  ;;  %v1101_v58 = vadd.f32 %v1100_v7, %v1034_v35  ;;  %v1106_v17 = vrot.slane %v1035_v10, 4 }
 0x15c   : > { %v1144_v16 = vmul.f32 %v1093_v5, %v2415_v25  ;;  %v1243_v15 = vmul.f32 %v1734_v54, %v1242_v12  ;;  %v1407_v39 = vperm.slane %v2451_v19, 7  ;;  %v1356_v1 = vperm.slane %v2660_v52, 0 }
 0x15d   : > { %v1386_v20 = vmul.f32 %v1354_v48, %v1334_v11  ;;  %v1145_v61 = vmul.f32 %v1099_v41, %v2415_v25  ;;  %v1102_v21 = vrot.slane %v1101_v58, 2  ;;  %v1107_v43 = vadd.f32 %v1106_v17, %v1035_v10 }
 0x15e   : > { %v2638_v0 = vadd.f32 1e-05, %v1144_v16  ;;  %v1247_v34 = vsel %vm1246_vm8, %v1734_v54, %v1243_v15  ;;  %v1408_v35 = vperm.slane %v2668_v57, 0 }
 0x15f   : > { %v2644_v22 = vpop.f32.mrf.mxu0  ;;  %v2646_v24 = vpop.f32.mrf.mxu1  ;;  %v1438_v33 = vadd.f32 %v1406_v2, %v1386_v20  ;;  %v1335_v30 = vmul.f32 %v1247_v34, %v2552_v40  ;;  %v2651_v49 = vadd.f32 1e-05, %v1145_v61  ;;  %v1103_v18 = vadd.f32 %v1102_v21, %v1101_v58 }
 0x160   : > { %1735 = vrsqrt.f32 %v2638_v0  ;;  %v961_v38 = vrot.slane %v2644_v22, 4  ;;  %v967_v44 = vrot.slane %v2646_v24, 4  ;;  %v1108_v19 = vrot.slane %v1107_v43, 2 }
 0x161   : > { %v1454_v36 = vmax.f32 %v1438_v33, 0.0  ;;  %v1387_v37 = vmul.f32 %v1355_v42, %v1335_v30  ;;  %1737 = vrsqrt.f32 %v2651_v49  ;;  %v1104_v46 = vrot.slane %v1103_v18, 1 }
 0x162   : > { %v962_v13 = vadd.f32 %v961_v38, %v2644_v22  ;;  %v968_v40 = vadd.f32 %v967_v44, %v2646_v24  ;;  %v1109_v9 = vadd.f32 %v1108_v19, %v1107_v43  ;;  %vm1254_vm9 = vweird.f32 %v2638_v0 }
 0x163   : > { %1470 = vst [vmem:[%s2534_s25 + $0x30] sm:$0xff] %v1454_v36  ;;  %v1439_v47 = vadd.f32 %v1407_v39, %v1387_v37  ;;  %v1105_v48 = vadd.f32 %v1104_v46, %v1103_v18  ;;  %vm1264_vm11 = vweird.f32 %v2651_v49 }
 0x164   : > { %v963_v31 = vrot.slane %v962_v13, 2  ;;  %v969_v54 = vrot.slane %v968_v40, 2  ;;  %v1110_v60 = vrot.slane %v1109_v9, 1 }
 0x165   : > { %v1455_v53 = vmax.f32 %v1439_v47, 0.0  ;;  %v1146_v32 = vmul.f32 %v1105_v48, %v2415_v25 }
 0x166   : > { %v1736_v26 = vpop.eup %1735  ;;  %v2662_v55 = vpop.f32.mrf.mxu2  ;;  %v964_v28 = vadd.f32 %v963_v31, %v962_v13  ;;  %v970_v23 = vadd.f32 %v969_v54, %v968_v40  ;;  %v1111_v14 = vadd.f32 %v1110_v60, %v1109_v9 }
 0x167   : > { %v2664_v27 = vpop.f32.mrf.mxu3  ;;  %v1249_v56 = vmul.f32 %v1736_v26, %v2638_v0  ;;  %v973_v29 = vrot.slane %v2662_v55, 4  ;;  %v1738_v62 = vpop.eup %1737  ;;  %1471 = vst [vmem:[%s2534_s25 + $0x38] sm:$0xff] %v1455_v53  ;;  %v2674_v2 = vadd.f32 1e-05, %v1146_v32  ;;  %vm1255_vm10 = vweird.f32 %v1736_v26 }
 0x168   : > { %v979_v51 = vrot.slane %v2664_v27, 4  ;;  %v1259_v3 = vmul.f32 %v1738_v62, %v2651_v49  ;;  %v965_v5 = vrot.slane %v964_v28, 1  ;;  %v971_v45 = vrot.slane %v970_v23, 1  ;;  %vm1256_vm12 = vmor %vm1254_vm9, %vm1255_vm10 }
 0x169   : > { %v1250_v63 = vmul.f32 %v1736_v26, %v1249_v56  ;;  %1739 = vrsqrt.f32 %v2674_v2  ;;  %v1147_v11 = vmul.f32 %v1111_v14, %v2415_v25  ;;  %v974_v16 = vadd.f32 %v973_v29, %v2662_v55 }
 0x16a   : > { %v1260_v7 = vmul.f32 %v1738_v62, %v1259_v3  ;;  %v966_v12 = vadd.f32 %v965_v5, %v964_v28  ;;  %v972_v41 = vadd.f32 %v971_v45, %v970_v23  ;;  %v980_v58 = vadd.f32 %v979_v51, %v2664_v27 }
 0x16b   : > { %v1251_v6 = vmul.f32 0.5, %v1250_v63  ;;  %v2684_v15 = vadd.f32 1e-05, %v1147_v11  ;;  %v975_v42 = vrot.slane %v974_v16, 2  ;;  %vm1265_vm13 = vweird.f32 %v1738_v62 }
 0x16c   : > { %v1261_v20 = vmul.f32 0.5, %v1260_v7  ;;  %v1004_v17 = vmul.f32 %v2415_v25, %v966_v12  ;;  %v1005_v21 = vmul.f32 %v2415_v25, %v972_v41  ;;  %v981_v33 = vrot.slane %v980_v58, 2  ;;  %vm1266_vm14 = vmor %vm1264_vm11, %vm1265_vm13 }
 0x16d   : > { %v1252_v10 = vsub.f32 1.5, %v1251_v6  ;;  %1741 = vrsqrt.f32 %v2684_v15  ;;  %v976_v36 = vadd.f32 %v975_v42, %v974_v16  ;;  %v1357_v0 = vperm.slane %v2660_v52, 1 }
 0x16e   : > { %v1262_v34 = vsub.f32 1.5, %v1261_v20  ;;  %v2693_v39 = vsub.f32 %v2644_v22, %v1004_v17  ;;  %v2696_v43 = vsub.f32 %v2646_v24, %v1005_v21  ;;  %v982_v38 = vadd.f32 %v981_v33, %v980_v58 }
 0x16f   : > { %v1253_v61 = vmul.f32 %v1736_v26, %v1252_v10  ;;  %v1740_v30 = vpop.eup %1739  ;;  %v977_v24 = vrot.slane %v976_v36, 1  ;;  %v1358_v28 = vperm.slane %v2660_v52, 2  ;;  %vm1274_vm0 = vweird.f32 %v2674_v2 }
 0x170   : > { %v1263_v37 = vmul.f32 %v1738_v62, %v1262_v34  ;;  %v1269_v46 = vmul.f32 %v1740_v30, %v2674_v2  ;;  %v1036_v22 = vmul.f32 %v2693_v39, %v2693_v39  ;;  %v1037_v19 = vmul.f32 %v2696_v43, %v2696_v43 }
 0x171   : > { %v1257_v18 = vsel %vm1256_vm12, %v1736_v26, %v1253_v61  ;;  %v983_v13 = vrot.slane %v982_v38, 1  ;;  %v1409_v26 = vperm.slane %v2668_v57, 1  ;;  %v978_v56 = vadd.f32 %v977_v24, %v976_v36 }
 0x172   : > { %v1336_v44 = vmul.f32 %v1257_v18, %v2581_v4  ;;  %v1267_v47 = vsel %vm1266_vm14, %v1738_v62, %v1263_v37  ;;  %v1270_v48 = vmul.f32 %v1740_v30, %v1269_v46  ;;  %v1112_v9 = vrot.slane %v1036_v22, 4 }
 0x173   : > { %v1337_v4 = vmul.f32 %v1267_v47, %v2590_v8  ;;  %v1118_v31 = vrot.slane %v1037_v19, 4  ;;  %v1742_v54 = vpop.eup %1741  ;;  %v984_v32 = vadd.f32 %v983_v13, %v982_v38  ;;  %vm1275_vm15 = vweird.f32 %v1740_v30 }
 0x174   : > { %v1388_v40 = vmul.f32 %v1356_v1, %v1336_v44  ;;  %v1271_v53 = vmul.f32 0.5, %v1270_v48  ;;  %v1279_v23 = vmul.f32 %v1742_v54, %v2684_v15  ;;  %v1113_v29 = vadd.f32 %v1112_v9, %v1036_v22  ;;  %vm1276_vm1 = vmor %vm1274_vm0, %vm1275_vm15 }
 0x175   : > { %v1389_v60 = vmul.f32 %v1357_v0, %v1337_v4  ;;  %v1119_v8 = vadd.f32 %v1118_v31, %v1037_v19  ;;  %v1006_v5 = vmul.f32 %v2415_v25, %v978_v56  ;;  %v1007_v6 = vmul.f32 %v2415_v25, %v984_v32 }
 0x176   : > { %v1440_v49 = vadd.f32 %v1408_v35, %v1388_v40  ;;  %v1272_v63 = vsub.f32 1.5, %v1271_v53  ;;  %v1280_v51 = vmul.f32 %v1742_v54, %v1279_v23  ;;  %v1114_v35 = vrot.slane %v1113_v29, 2 }
 0x177   : > { %v1441_v1 = vadd.f32 %v1409_v26, %v1389_v60  ;;  %v1120_v14 = vrot.slane %v1119_v8, 2  ;;  %v1410_v7 = vperm.slane %v2668_v57, 2  ;;  %v2717_v2 = vsub.f32 %v2662_v55, %v1006_v5 }
 0x178   : > { %v1456_v62 = vmax.f32 %v1440_v49, 0.0  ;;  %v1273_v3 = vmul.f32 %v1740_v30, %v1272_v63  ;;  %v1281_v11 = vmul.f32 0.5, %v1280_v51  ;;  %v1115_v12 = vadd.f32 %v1114_v35, %v1113_v29 }
 0x179   : > { %v1457_v45 = vmax.f32 %v1441_v1, 0.0  ;;  %v1121_v10 = vadd.f32 %v1120_v14, %v1119_v8  ;;  %v2720_v41 = vsub.f32 %v2664_v27, %v1007_v6  ;;  %vm1285_vm2 = vweird.f32 %v1742_v54 }
 0x17a   : > { %1472 = vst [vmem:[%s2534_s25 + $0x40] sm:$0xff] %v1456_v62  ;;  %v1277_v16 = vsel %vm1276_vm1, %v1740_v30, %v1273_v3  ;;  %v1282_v20 = vsub.f32 1.5, %v1281_v11  ;;  %v1116_v17 = vrot.slane %v1115_v12, 1  ;;  %v1038_v61 = vmul.f32 %v2717_v2, %v2717_v2 }
 0x17b   : > { %1473 = vst [vmem:[%s2534_s25 + $0x48] sm:$0xff] %v1457_v45  ;;  %v1338_v58 = vmul.f32 %v1277_v16, %v2620_v59  ;;  %v1122_v42 = vrot.slane %v1121_v10, 1  ;;  %v1039_v21 = vmul.f32 %v2720_v41, %v2720_v41  ;;  %vm1284_vm3 = vweird.f32 %v2684_v15 }
 0x17c   : > { %v1283_v34 = vmul.f32 %v1742_v54, %v1282_v20  ;;  %v1117_v55 = vadd.f32 %v1116_v17, %v1115_v12  ;;  %vm1286_vm4 = vmor %vm1284_vm3, %vm1285_vm2  ;;  %v1359_v27 = vperm.slane %v2660_v52, 3  ;;  %v1124_v59 = vrot.slane %v1038_v61, 4 }
 0x17d   : > { %v1390_v33 = vmul.f32 %v1358_v28, %v1338_v58  ;;  %v1123_v30 = vadd.f32 %v1122_v42, %v1121_v10  ;;  %v1130_v18 = vrot.slane %v1039_v21, 4  ;;  %v1411_v0 = vperm.slane %v2668_v57, 3 }
 0x17e   : > { %v1287_v38 = vsel %vm1286_vm4, %v1742_v54, %v1283_v34  ;;  %v1148_v44 = vmul.f32 %v1117_v55, %v2415_v25  ;;  %v1125_v22 = vadd.f32 %v1124_v59, %v1038_v61  ;;  %v1360_v6 = vperm.slane %v2660_v52, 4 }
 0x17f   : > { %v1442_v36 = vadd.f32 %v1410_v7, %v1390_v33  ;;  %v1339_v37 = vmul.f32 %v1287_v38, %v2623_v50  ;;  %v1149_v46 = vmul.f32 %v1123_v30, %v2415_v25  ;;  %v1131_v24 = vadd.f32 %v1130_v18, %v1039_v21 }
 0x180   : > { %v1164_v19 = vadd.f32 1e-05, %v1148_v44  ;;  %v1126_v47 = vrot.slane %v1125_v22, 2  ;;  %v1361_v11 = vperm.slane %v2660_v52, 5  ;;  %v1412_v10 = vperm.slane %v2668_v57, 4 }
 0x181   : > { %v1458_v15 = vmax.f32 %v1442_v36, 0.0  ;;  %v1391_v13 = vmul.f32 %v1359_v27, %v1339_v37  ;;  %v1165_v40 = vadd.f32 1e-05, %v1149_v46  ;;  %v1132_v48 = vrot.slane %v1131_v24, 2 }
 0x182   : > { %1743 = vrsqrt.f32 %v1164_v19  ;;  %v1127_v26 = vadd.f32 %v1126_v47, %v1125_v22  ;;  %vm1294_vm7 = vweird.f32 %v1164_v19  ;;  %v1413_v42 = vperm.slane %v2668_v57, 5 }
 0x183   : > { %1474 = vst [vmem:[%s2534_s25 + $0x50] sm:$0xff] %v1458_v15  ;;  %v1443_v4 = vadd.f32 %v1411_v0, %v1391_v13  ;;  %1745 = vrsqrt.f32 %v1165_v40  ;;  %v1133_v9 = vadd.f32 %v1132_v48, %v1131_v24  ;;  %vm1304_vm9 = vweird.f32 %v1165_v40 }
 0x184   : > { %v1128_v31 = vrot.slane %v1127_v26, 1  ;;  %v1362_v37 = vperm.slane %v2660_v52, 6  ;;  %v1363_v22 = vperm.slane %v2660_v52, 7 }
 0x185   : > { %v1459_v50 = vmax.f32 %v1443_v4, 0.0  ;;  %v1134_v54 = vrot.slane %v1133_v9, 1 }
 0x186   : > { %v1129_v49 = vadd.f32 %v1128_v31, %v1127_v26 }
 0x187   : > { %1475 = vst [vmem:[%s2534_s25 + $0x58] sm:$0xff] %v1459_v50  ;;  %v1135_v56 = vadd.f32 %v1134_v54, %v1133_v9 }
 0x188   : > { %v1744_v53 = vpop.eup %1743  ;;  %v1150_v28 = vmul.f32 %v1129_v49, %v2415_v25 }
 0x189   : > { %v1746_v32 = vpop.eup %1745  ;;  %v1289_v60 = vmul.f32 %v1744_v53, %v1164_v19  ;;  %v1151_v29 = vmul.f32 %v1135_v56, %v2415_v25  ;;  %vm1295_vm5 = vweird.f32 %v1744_v53  ;;  %v1414_v19 = vperm.slane %v2668_v57, 6 }
 0x18a   : > { %v1299_v23 = vmul.f32 %v1746_v32, %v1165_v40  ;;  %v1166_v63 = vadd.f32 1e-05, %v1150_v28  ;;  %vm1305_vm6 = vweird.f32 %v1746_v32  ;;  %vm1296_vm8 = vmor %vm1294_vm7, %vm1295_vm5  ;;  %v1415_v40 = vperm.slane %v2668_v57, 7 }
 0x18b   : > { %v1290_v62 = vmul.f32 %v1744_v53, %v1289_v60  ;;  %v1167_v1 = vadd.f32 1e-05, %v1151_v29  ;;  %vm1306_vm10 = vmor %vm1304_vm9, %vm1305_vm6 }
 0x18c   : > { %v1300_v8 = vmul.f32 %v1746_v32, %v1299_v23  ;;  %1747 = vrsqrt.f32 %v1166_v63  ;;  %vm1314_vm13 = vweird.f32 %v1166_v63 }
 0x18d   : > { %v1291_v51 = vmul.f32 0.5, %v1290_v62  ;;  %1749 = vrsqrt.f32 %v1167_v1  ;;  %vm1324_vm15 = vweird.f32 %v1167_v1 }
 0x18e   : > { %v1301_v35 = vmul.f32 0.5, %v1300_v8 }
 0x18f   : > { %v1292_v3 = vsub.f32 1.5, %v1291_v51 }
 0x190   : > { %v1302_v14 = vsub.f32 1.5, %v1301_v35 }
 0x191   : > { %v1293_v5 = vmul.f32 %v1744_v53, %v1292_v3 }
 0x192   : > { %v1303_v45 = vmul.f32 %v1746_v32, %v1302_v14  ;;  %v1748_v25 = vpop.eup %1747 }
 0x193   : > { %v1297_v7 = vsel %vm1296_vm8, %v1744_v53, %v1293_v5  ;;  %v1750_v12 = vpop.eup %1749  ;;  %v1309_v20 = vmul.f32 %v1748_v25, %v1166_v63  ;;  %vm1315_vm11 = vweird.f32 %v1748_v25 }
 0x194   : > { %v1340_v16 = vmul.f32 %v1297_v7, %v2693_v39  ;;  %v1307_v58 = vsel %vm1306_vm10, %v1746_v32, %v1303_v45  ;;  %v1319_v61 = vmul.f32 %v1750_v12, %v1167_v1  ;;  %vm1325_vm12 = vweird.f32 %v1750_v12  ;;  %vm1316_vm14 = vmor %vm1314_vm13, %vm1315_vm11 }
 0x195   : > { %v1341_v17 = vmul.f32 %v1307_v58, %v2696_v43  ;;  %v1310_v33 = vmul.f32 %v1748_v25, %v1309_v20  ;;  %vm1326_vm0 = vmor %vm1324_vm15, %vm1325_vm12 }
 0x196   : > { %v1392_v21 = vmul.f32 %v1360_v6, %v1340_v16  ;;  %v1320_v55 = vmul.f32 %v1750_v12, %v1319_v61 }
 0x197   : > { %v1393_v34 = vmul.f32 %v1361_v11, %v1341_v17  ;;  %v1311_v30 = vmul.f32 0.5, %v1310_v33 }
 0x198   : > { %v1444_v27 = vadd.f32 %v1412_v10, %v1392_v21  ;;  %v1321_v39 = vmul.f32 0.5, %v1320_v55 }
 0x199   : > { %v1445_v59 = vadd.f32 %v1413_v42, %v1393_v34  ;;  %v1312_v36 = vsub.f32 1.5, %v1311_v30 }
 0x19a   : > { %v1460_v18 = vmax.f32 %v1444_v27, 0.0  ;;  %v1322_v44 = vsub.f32 1.5, %v1321_v39 }
 0x19b   : > { %v1461_v38 = vmax.f32 %v1445_v59, 0.0  ;;  %v1313_v43 = vmul.f32 %v1748_v25, %v1312_v36 }
 0x19c   : > { %1476 = vst [vmem:[%s2534_s25 + $0x60] sm:$0xff] %v1460_v18  ;;  %v1323_v0 = vmul.f32 %v1750_v12, %v1322_v44 }
 0x19d   : > { %1477 = vst [vmem:[%s2534_s25 + $0x68] sm:$0xff] %v1461_v38  ;;  %v1317_v46 = vsel %vm1316_vm14, %v1748_v25, %v1313_v43 }
 0x19e   : > { %v1342_v15 = vmul.f32 %v1317_v46, %v2717_v2  ;;  %v1327_v24 = vsel %vm1326_vm0, %v1750_v12, %v1323_v0 }
 0x19f   : > { %v1343_v13 = vmul.f32 %v1327_v24, %v2720_v41 }
 0x1a0   : > { %v1394_v47 = vmul.f32 %v1362_v37, %v1342_v15 }
 0x1a1   : > { %v1395_v48 = vmul.f32 %v1363_v22, %v1343_v13 }
 0x1a2   : > { %v1446_v52 = vadd.f32 %v1414_v19, %v1394_v47 }
 0x1a3   : > { %v1447_v2 = vadd.f32 %v1415_v40, %v1395_v48 }
 0x1a4   : > { %v1462_v4 = vmax.f32 %v1446_v52, 0.0 }
 0x1a5   : > { %v1463_v26 = vmax.f32 %v1447_v2, 0.0 }
 0x1a6   : > { %1478 = vst [vmem:[%s2534_s25 + $0x70] sm:$0xff] %v1462_v4 }
 0x1a7   : > { %1479 = vst [vmem:[%s2534_s25 + $0x78] sm:$0xff] %v1463_v26 }
 0x1a8   : > { %1898 = shalt.err (!%p1895_p3)
}
 0x1a9   : > { %1656 = dma.vmem_to_hbm [thread:$0]  (%p2062_p9), %s1495_s22, 2048, %s1497_s20, %s1481_s8  }
 0x1aa PF: > { %p1679_p4 = scmp.ge.s32.totalorder %s1945_s18, 2  ;;  %s1508_s11 = sand.u32 1, %s1933_s15  }
 0x1ab   : > { %s1509_s10 = scalar_lea.sflag [#allocation4], %s1508_s11 }
 0x1ac   : > { %p1673_p6 = pnand %p1679_p4, %p2066_p10 }
 0x1ae   : > { %p1674_p11 = pneg %p1673_p6 }
 0x1b0   : > { %1928 = dma.done.wait (%p1674_p11), %s1509_s10, 2048  }
 0x1b1   : > { %1930 = vsyncadd (%p1674_p11), %s1509_s10, 4294965248  ;;  %s2810_s13 = sld [smem:[#allocation15_spill]]  ;;  %p21_p0 = scmp.ge.s32.totalorder %s1998_s19, 6  }
 0x1b2   : > { %s2811_s15 = smov %s1937_s16  ;;  %s2812_s16 = smov %s1941_s17 }
 0x1b3   : > { %s2814_s18 = smov %s1998_s19  ;;  %23 = sbr.rel (!%p21_p0) target bundleno = 11 (0xb), region = 110 }
 0x1b7   : > { %s2813_s17 = smov %s2810_s13 }
 0x1b8   :  { %1515 = vsyncpa [#allocation3], 1 }
 0x1b9   :  { %1517 = vsyncpa [#allocation3 + $0x1], 1 }
 0x1ba   :  { %1518 = vsyncpa [#allocation6], 1 }
 0x1bb   :  { %1520 = vsyncpa [#allocation6 + $0x1], 1 }
 0x1bc   :  { %1521 = vsyncpa [#allocation9], 1 }
 0x1bd   :  { %1523 = vsyncpa [#allocation9 + $0x1], 1 }
 0x1be   :  { %1524 = vsyncpa [#allocation4], 1 }
 0x1bf   :  { %1526 = vsyncpa [#allocation4 + $0x1], 1 }

</bundles_post_ra>
